<compile_context>
chip_gen: v5e
topology: v5e:2x2
jax: 0.10.0
libtpu: 0.0.40
codegen_flags: <defaults>
</compile_context>

<pallas_src>
import jax
import jax.numpy as jnp
from jax.experimental import pallas as pl
from jax.experimental.pallas import tpu as pltpu


_NEG_BIG = -1e30  # finite "-inf" for padded vocab columns (exp underflows to 0)


def _round_up(x, m):
    return (x + m - 1) // m * m


def _generator_kernel(x_ref, w_ref, b_ref, o_ref, m_ref, l_ref):
    # Grid = (row_blocks, 2 passes, vocab_blocks).
    #   pass 0: online accumulation of running max m and running sum-exp l
    #           over vocab blocks; at the last block fold lse = m + log(l).
    #   pass 1: recompute the logits block (matmul only, no extra exp) and
    #           write logits - lse to the output tile.
    p = pl.program_id(1)
    k = pl.program_id(2)
    nk = pl.num_programs(2)

    # bf16 x bf16 -> f32 accumulate on the MXU; bias + softmax math in f32.
    logits = jnp.dot(
        x_ref[...], w_ref[...], preferred_element_type=jnp.float32
    ) + b_ref[...]

    @pl.when(jnp.logical_and(p == 0, k == 0))
    def _init():
        m_ref[...] = jnp.full_like(m_ref, -jnp.inf)
        l_ref[...] = jnp.zeros_like(l_ref)

    @pl.when(p == 0)
    def _accumulate():
        m_prev = m_ref[...]
        m_new = jnp.maximum(m_prev, jnp.max(logits, axis=-1, keepdims=True))
        alpha = jnp.exp(m_prev - m_new)  # rescale previously accumulated sum
        l_ref[...] = alpha * l_ref[...] + jnp.sum(
            jnp.exp(logits - m_new), axis=-1, keepdims=True)
        m_ref[...] = m_new

    @pl.when(jnp.logical_and(p == 0, k == nk - 1))
    def _finalize_lse():
        # One log per row; m_ref now holds the full log-sum-exp for this tile.
        m_ref[...] = m_ref[...] + jnp.log(l_ref[...])

    @pl.when(p == 1)
    def _write():
        o_ref[...] = (logits - m_ref[...]).astype(o_ref.dtype)


def generator_forward(x, w, b, *, tm=256, tn=2048, out_dtype=jnp.float32,
                      vmem_limit_bytes=64 * 1024 * 1024):
    """log_softmax(x @ w + b, axis=-1).

    x: (..., d_model); w: (d_model, vocab) (transpose of PyTorch's nn.Linear
    weight); b: (vocab,).  Returns (..., vocab) in `out_dtype`.
    """
    d_model, vocab = w.shape
    lead_shape = x.shape[:-1]
    x2 = x.reshape(-1, d_model)
    M = x2.shape[0]

    # ----- tile sizes ------------------------------------------------------
    tm = max(8, tm)  # row tile; 256 default fills the 128/256 MXU M-dim
    # Vocab tile: lane-dense multiple of 128, clamped so small vocabularies
    # use a single (resident) weight block.
    tn_eff = min(_round_up(tn, 128), _round_up(vocab, 128))
    Mp = _round_up(M, tm)
    Vp = _round_up(vocab, tn_eff)

    # ----- padding + dtype prep (cheap wrapper-side XLA ops) ---------------
    xp = jnp.zeros((Mp, d_model), x2.dtype).at[:M].set(x2)
    wp = jnp.zeros((d_model, Vp), w.dtype).at[:, :vocab].set(w)
    bp = jnp.full((1, Vp), _NEG_BIG, jnp.float32).at[0, :vocab].set(
        b.astype(jnp.float32))

    # bf16 MXU inputs: ~2x MXU throughput and half the HBM/VMEM bytes for W.
    xb = xp.astype(jnp.bfloat16)
    wb = wp.astype(jnp.bfloat16)

    grid = (Mp // tm, 2, Vp // tn_eff)

    out = pl.pallas_call(
        _generator_kernel,
        out_shape=jax.ShapeDtypeStruct((Mp, Vp), out_dtype),
        grid_spec=pltpu.PrefetchScalarGridSpec(
            num_scalar_prefetch=0,
            grid=grid,
            in_specs=[
                # x row tile: resident across the pass/vocab axes.
                pl.BlockSpec((tm, d_model), lambda i, p, k: (i, 0)),
                # weight vocab tile: streamed along k (resident if Vp == tn).
                pl.BlockSpec((d_model, tn_eff), lambda i, p, k: (0, k)),
                pl.BlockSpec((1, tn_eff), lambda i, p, k: (0, k)),
            ],
            # During pass 0 the output index parks at (i, 0) and is never
            # written (no junk writeback); pass 1 visits (i, k) and writes.
            out_specs=pl.BlockSpec((tm, tn_eff), lambda i, p, k: (i, k * p)),
            scratch_shapes=[
                pltpu.VMEM((tm, 1), jnp.float32),  # running max / final lse
                pltpu.VMEM((tm, 1), jnp.float32),  # running sum-exp
            ],
        ),
        compiler_params=pltpu.CompilerParams(
            dimension_semantics=("parallel", "arbitrary", "arbitrary"),
            vmem_limit_bytes=vmem_limit_bytes,
        ),
    )(xb, wb, bp)

    return out[:M, :vocab].reshape(*lead_shape, vocab)


if __name__ == "__main__":
    # Small shapes consistent with the module: batch=2, seq=8, d_model=32, vocab=128
    batch, seq, d_model, vocab = 2, 8, 32, 128

    key = jax.random.PRNGKey(0)
    kx, kw, kb = jax.random.split(key, 3)

    x = jax.random.normal(kx, (batch, seq, d_model), dtype=jnp.float32)
    # Deterministic parameter init mimicking nn.Linear (uniform +/- 1/sqrt(d_model)).
    bound = 1.0 / jnp.sqrt(jnp.float32(d_model))
    w = jax.random.uniform(kw, (d_model, vocab), jnp.float32, -bound, bound)
    b = jax.random.uniform(kb, (vocab,), jnp.float32, -bound, bound)

    out = jax.block_until_ready(generator_forward(x, w, b))
    assert out.shape == (batch, seq, vocab)

    # Reference applying the same bf16 input quantization the kernel uses on
    # the MXU (accumulation and softmax are f32 in both paths).
    xq = x.astype(jnp.bfloat16).astype(jnp.float32)
    wq = w.astype(jnp.bfloat16).astype(jnp.float32)
    ref = jax.nn.log_softmax(xq @ wq + b, axis=-1)
    assert jnp.allclose(out, ref, atol=2e-3, rtol=2e-3), float(
        jnp.max(jnp.abs(out - ref)))

    print("KERNEL_OK")
</pallas_src>

<mosaic_0001>
module attributes {stable_mosaic.version = 11 : i64} {
  func.func @_generator_kernel(%arg0: i32, %arg1: i32, %arg2: i32, %arg3: memref<256x32xbf16, #tpu.memory_space<vmem>>, %arg4: memref<32x128xbf16, #tpu.memory_space<vmem>>, %arg5: memref<1x128xf32, #tpu.memory_space<vmem>>, %arg6: memref<256x128xf32, #tpu.memory_space<vmem>>, %arg7: memref<256x1xf32, #tpu.memory_space<vmem>>, %arg8: memref<256x1xf32, #tpu.memory_space<vmem>>) attributes {dimension_semantics = [#tpu.dimension_semantics<parallel>, #tpu.dimension_semantics<arbitrary>, #tpu.dimension_semantics<arbitrary>], iteration_bounds = array<i64: 1, 2, 1>, scalar_prefetch = 0 : i64, scratch_operands = 2 : i64, tpu.core_type = #tpu.core_type<tc>, window_params = [{transform_indices = @transform_0, window_bounds = array<i64: 256, 32>}, {transform_indices = @transform_1, window_bounds = array<i64: 32, 128>}, {transform_indices = @transform_2, window_bounds = array<i64: 1, 128>}, {transform_indices = @transform_3, window_bounds = array<i64: 256, 128>}]} {
    %c0 = arith.constant 0 : index
    %c0_0 = arith.constant 0 : index
    %0 = vector.load %arg3[%c0, %c0_0] : memref<256x32xbf16, #tpu.memory_space<vmem>>, vector<256x32xbf16>
    %c0_1 = arith.constant 0 : index
    %c0_2 = arith.constant 0 : index
    %1 = vector.load %arg4[%c0_1, %c0_2] : memref<32x128xbf16, #tpu.memory_space<vmem>>, vector<32x128xbf16>
    %cst = arith.constant dense<0.000000e+00> : vector<256x128xf32>
    %2 = tpu.matmul %0, %1, %cst {dimension_numbers = #tpu.dot_dimension_numbers<[1], [0], [0], [1], [0, 0, 1, 1], [], []>} : vector<256x32xbf16>, vector<32x128xbf16>, vector<256x128xf32> -> vector<256x128xf32>
    %c0_3 = arith.constant 0 : index
    %c0_4 = arith.constant 0 : index
    %3 = vector.load %arg5[%c0_3, %c0_4] : memref<1x128xf32, #tpu.memory_space<vmem>>, vector<1x128xf32>
    %4 = vector.broadcast %3 : vector<1x128xf32> to vector<256x128xf32>
    %5 = arith.addf %2, %4 : vector<256x128xf32>
    %c0_i32 = arith.constant 0 : i32
    %6 = arith.cmpi eq, %arg1, %c0_i32 : i32
    %c0_i32_5 = arith.constant 0 : i32
    %7 = arith.cmpi eq, %arg2, %c0_i32_5 : i32
    %8 = arith.andi %6, %7 : i1
    %9 = arith.extui %8 : i1 to i32
    %c0_i32_6 = arith.constant 0 : i32
    %10 = arith.cmpi ne, %9, %c0_i32_6 : i32
    scf.if %10 {
      %cst_13 = arith.constant 0xFF800000 : f32
      %22 = vector.broadcast %cst_13 : f32 to vector<256x1xf32>
      %c0_14 = arith.constant 0 : index
      %c0_15 = arith.constant 0 : index
      %23 = vector.load %arg7[%c0_14, %c0_15] : memref<256x1xf32, #tpu.memory_space<vmem>>, vector<256x1xf32>
      tpu.vector_store %arg7[%c0_14, %c0_15], %22 {strides = array<i32>} : memref<256x1xf32, #tpu.memory_space<vmem>>, vector<256x1xf32>,
      %cst_16 = arith.constant 0.000000e+00 : f32
      %24 = vector.broadcast %cst_16 : f32 to vector<256x1xf32>
      %c0_17 = arith.constant 0 : index
      %c0_18 = arith.constant 0 : index
      %25 = vector.load %arg8[%c0_17, %c0_18] : memref<256x1xf32, #tpu.memory_space<vmem>>, vector<256x1xf32>
      tpu.vector_store %arg8[%c0_17, %c0_18], %24 {strides = array<i32>} : memref<256x1xf32, #tpu.memory_space<vmem>>, vector<256x1xf32>,
    } else {
    }
    %c0_i32_7 = arith.constant 0 : i32
    %11 = arith.cmpi eq, %arg1, %c0_i32_7 : i32
    %12 = arith.extui %11 : i1 to i32
    %c0_i32_8 = arith.constant 0 : i32
    %13 = arith.cmpi ne, %12, %c0_i32_8 : i32
    scf.if %13 {
      %c0_13 = arith.constant 0 : index
      %c0_14 = arith.constant 0 : index
      %22 = vector.load %arg7[%c0_13, %c0_14] : memref<256x1xf32, #tpu.memory_space<vmem>>, vector<256x1xf32>
      %cst_15 = arith.constant dense<0xFF800000> : vector<256xf32>
      %23 = vector.multi_reduction <maximumf>, %5, %cst_15 [1] : vector<256x128xf32> to vector<256xf32>
      %24 = vector.shape_cast %23 : vector<256xf32> to vector<256x1xf32>
      %25 = arith.maximumf %22, %24 : vector<256x1xf32>
      %26 = arith.subf %22, %25 : vector<256x1xf32>
      %27 = math.exp %26 : vector<256x1xf32>
      %c0_16 = arith.constant 0 : index
      %c0_17 = arith.constant 0 : index
      %28 = vector.load %arg8[%c0_16, %c0_17] : memref<256x1xf32, #tpu.memory_space<vmem>>, vector<256x1xf32>
      %29 = arith.mulf %27, %28 : vector<256x1xf32>
      %30 = vector.broadcast %25 : vector<256x1xf32> to vector<256x128xf32>
      %31 = arith.subf %5, %30 : vector<256x128xf32>
      %32 = math.exp %31 : vector<256x128xf32>
      %cst_18 = arith.constant dense<0.000000e+00> : vector<256xf32>
      %33 = vector.multi_reduction <add>, %32, %cst_18 [1] : vector<256x128xf32> to vector<256xf32>
      %34 = vector.shape_cast %33 : vector<256xf32> to vector<256x1xf32>
      %35 = arith.addf %29, %34 : vector<256x1xf32>
      %c0_19 = arith.constant 0 : index
      %c0_20 = arith.constant 0 : index
      %36 = vector.load %arg8[%c0_19, %c0_20] : memref<256x1xf32, #tpu.memory_space<vmem>>, vector<256x1xf32>
      tpu.vector_store %arg8[%c0_19, %c0_20], %35 {strides = array<i32>} : memref<256x1xf32, #tpu.memory_space<vmem>>, vector<256x1xf32>,
      %c0_21 = arith.constant 0 : index
      %c0_22 = arith.constant 0 : index
      %37 = vector.load %arg7[%c0_21, %c0_22] : memref<256x1xf32, #tpu.memory_space<vmem>>, vector<256x1xf32>
      tpu.vector_store %arg7[%c0_21, %c0_22], %25 {strides = array<i32>} : memref<256x1xf32, #tpu.memory_space<vmem>>, vector<256x1xf32>,
    } else {
    }
    %c0_i32_9 = arith.constant 0 : i32
    %14 = arith.cmpi eq, %arg1, %c0_i32_9 : i32
    %c0_i32_10 = arith.constant 0 : i32
    %15 = arith.cmpi eq, %arg2, %c0_i32_10 : i32
    %16 = arith.andi %14, %15 : i1
    %17 = arith.extui %16 : i1 to i32
    %c0_i32_11 = arith.constant 0 : i32
    %18 = arith.cmpi ne, %17, %c0_i32_11 : i32
    scf.if %18 {
      %c0_13 = arith.constant 0 : index
      %c0_14 = arith.constant 0 : index
      %22 = vector.load %arg7[%c0_13, %c0_14] : memref<256x1xf32, #tpu.memory_space<vmem>>, vector<256x1xf32>
      %c0_15 = arith.constant 0 : index
      %c0_16 = arith.constant 0 : index
      %23 = vector.load %arg8[%c0_15, %c0_16] : memref<256x1xf32, #tpu.memory_space<vmem>>, vector<256x1xf32>
      %24 = math.log %23 : vector<256x1xf32>
      %25 = arith.addf %22, %24 : vector<256x1xf32>
      %c0_17 = arith.constant 0 : index
      %c0_18 = arith.constant 0 : index
      %26 = vector.load %arg7[%c0_17, %c0_18] : memref<256x1xf32, #tpu.memory_space<vmem>>, vector<256x1xf32>
      tpu.vector_store %arg7[%c0_17, %c0_18], %25 {strides = array<i32>} : memref<256x1xf32, #tpu.memory_space<vmem>>, vector<256x1xf32>,
    } else {
    }
    %c1_i32 = arith.constant 1 : i32
    %19 = arith.cmpi eq, %arg1, %c1_i32 : i32
    %20 = arith.extui %19 : i1 to i32
    %c0_i32_12 = arith.constant 0 : i32
    %21 = arith.cmpi ne, %20, %c0_i32_12 : i32
    scf.if %21 {
      %c0_13 = arith.constant 0 : index
      %c0_14 = arith.constant 0 : index
      %22 = vector.load %arg7[%c0_13, %c0_14] : memref<256x1xf32, #tpu.memory_space<vmem>>, vector<256x1xf32>
      %23 = vector.broadcast %22 : vector<256x1xf32> to vector<256x128xf32>
      %24 = arith.subf %5, %23 : vector<256x128xf32>
      %c0_15 = arith.constant 0 : index
      %c0_16 = arith.constant 0 : index
      %25 = vector.load %arg6[%c0_15, %c0_16] : memref<256x128xf32, #tpu.memory_space<vmem>>, vector<256x128xf32>
      tpu.vector_store %arg6[%c0_15, %c0_16], %24 {strides = array<i32>} : memref<256x128xf32, #tpu.memory_space<vmem>>, vector<256x128xf32>,
    } else {
    }
    return
  }
  func.func @transform_0(%arg0: i32, %arg1: i32, %arg2: i32) -> (i32, i32) {
    %c0_i32 = arith.constant 0 : i32
    %c0_i32_0 = arith.constant 0 : i32
    return %arg0, %c0_i32 : i32, i32
  }
  func.func @transform_1(%arg0: i32, %arg1: i32, %arg2: i32) -> (i32, i32) {
    %c0_i32 = arith.constant 0 : i32
    %c0_i32_0 = arith.constant 0 : i32
    return %c0_i32, %arg2 : i32, i32
  }
  func.func @transform_2(%arg0: i32, %arg1: i32, %arg2: i32) -> (i32, i32) {
    %c0_i32 = arith.constant 0 : i32
    %c0_i32_0 = arith.constant 0 : i32
    return %c0_i32, %arg2 : i32, i32
  }
  func.func @transform_3(%arg0: i32, %arg1: i32, %arg2: i32) -> (i32, i32) {
    %0 = arith.muli %arg2, %arg1 : i32
    %c0_i32 = arith.constant 0 : i32
    return %arg0, %0 : i32, i32
  }
}

</mosaic_0001>

<bundles_post_ra>
// kernel: tpu_custom_call.1
= control target key start
LH: loop header
LB: loop body
LE: loop exit
PB: predicated region body
PF: predicated region fallthrough
CT: control target
= control target key end

     0   :  { %8 = vsyncpa [#allocation5], 0  ;;  %s3163_s0 = inlined_call_operand.vmem [shape: bf16[256,32], index: 0, kind: input, shape index: {}]   ;;  %s3164_s1 = inlined_call_operand.vmem [shape: bf16[32,128], index: 1, kind: input, shape index: {}]   ;;  %s3165_s2 = inlined_call_operand.vmem [shape: f32[1,128], index: 2, kind: input, shape index: {}]   ;;  %s3166_s3 = inlined_call_operand.hbm [shape: f32[256,128], index: 3, kind: output, shape index: {}]  }
   0x1   :  { %10 = vsyncpa [#allocation5 + $0x1], 0  ;;  %s2306_s12 = smov 0   ;;  %s2308_s13 = smov 0  }
   0x2   :  { %s2310_s14 = smov 0  }
   0x3 LB: > { %s1855_s15 = sadd.s32 4294967295, %s2277_s14   ;;  %s1856_s16 = sadd.s32 4294967294, %s2277_s14   ;;  %s2277_s14 = sphi %s2310_s14, %s16_s14   ;;  %s2273_s13 = sphi %s2308_s13, %s3353_s13   ;;  %s2269_s12 = sphi %s2306_s12, %s3352_s12  }
   0x4   : > { %s31_s17 = sadd.s32 1, %s2273_s13  ;;  %p1861_p0 = scmp.ge.s32.totalorder %s2277_s14, 1 }
   0x5   : > { %p33_p1 = scmp.ge.s32.totalorder %s31_s17, 2  ;;  %p181_p2 = scmp.lt.s32.totalorder %s2277_s14, 3 }
   0x7   : > { %s3355_s17 = smov (%p33_p1, %s31_s17), 0  ;;  %p182_p3 = pnand %p1861_p0, %p181_p2 }
   0x9   : > { %185 = sbr.rel (%p182_p3) target bundleno = 960 (0x3c0), region = 32 }
   0xe   : > { %v1974_v0 = vld [vmem:[%s3164_s1 + $0x8] sm:$0xff]  ;;  %v1973_v1 = vld [vmem:[%s3164_s1] sm:$0xff]  ;;  %vm360_vm0 = vcmask 261120   ;;  %v1959_v10 = vld [vmem:[%s3163_s0 + $0x10] sm:$0xff]  ;;  %p498_p4 = scmp.eq.s32.totalorder %s2269_s12, 0 }
   0xf   : > { %415 = vmatpush.bf16.msra.mxu0 %v1974_v0  ;;  %1976 = vmatpush.bf16.msra.mxu1 %v1974_v0  ;;  %v1957_v2 = vld [vmem:[%s3163_s0] sm:$0xff]  ;;  %v1958_v6 = vld [vmem:[%s3163_s0 + $0x8] sm:$0xff]  ;;  %v1963_v11 = vld [vmem:[%s3163_s0 + $0x30] sm:$0xff]  ;;  %vm504_vm1 = vcmask (%p498_p4), 7168  }
  0x10   : > { %1977 = vmatpush.bf16.msra.mxu2 %v1974_v0  ;;  %1978 = vmatpush.bf16.msra.mxu3 %v1974_v0  ;;  %v1961_v3 = vld [vmem:[%s3163_s0 + $0x20] sm:$0xff]  ;;  %v1962_v7 = vld [vmem:[%s3163_s0 + $0x28] sm:$0xff]  ;;  %v1967_v12 = vld [vmem:[%s3163_s0 + $0x50] sm:$0xff] }
  0x11   : > { %v1965_v4 = vld [vmem:[%s3163_s0 + $0x40] sm:$0xff]  ;;  %v1966_v8 = vld [vmem:[%s3163_s0 + $0x48] sm:$0xff]  ;;  %v1971_v13 = vld [vmem:[%s3163_s0 + $0x70] sm:$0xff] }
  0x12   : > { %v1969_v5 = vld [vmem:[%s3163_s0 + $0x60] sm:$0xff]  ;;  %v1970_v9 = vld [vmem:[%s3163_s0 + $0x68] sm:$0xff]  ;;  %v1960_v14 = vld [vmem:[%s3163_s0 + $0x18] sm:$0xff] }
  0x13   : > { %416 = vmatpush.bf16.msra.mxu0 %v1973_v1  ;;  %1979 = vmatpush.bf16.msra.mxu1 %v1973_v1  ;;  %v1964_v15 = vld [vmem:[%s3163_s0 + $0x38] sm:$0xff]  ;;  %v2402_v18 = vld [vmem:[%s3165_s2] ss:$0 sm:$0xff] }
  0x14   : > { %1980 = vmatpush.bf16.msra.mxu2 %v1973_v1  ;;  %1981 = vmatpush.bf16.msra.mxu3 %v1973_v1  ;;  %v1968_v16 = vld [vmem:[%s3163_s0 + $0x58] sm:$0xff] }
  0x15   : > { %v1972_v17 = vld [vmem:[%s3163_s0 + $0x78] sm:$0xff] }
  0x16   : > { %1934 = vmatmul.msk.bf16.vlgmr.msra.gmra.mxu0 %vm360_vm0, %v1957_v2  ;;  %1938 = vmatmul.msk.bf16.vlgmr.msra.gmra.mxu1 %vm360_vm0, %v1961_v3 }
  0x17   : > { %1942 = vmatmul.msk.bf16.vlgmr.msra.gmra.mxu2 %vm360_vm0, %v1965_v4  ;;  %1946 = vmatmul.msk.bf16.vlgmr.msra.gmra.mxu3 %vm360_vm0, %v1969_v5 }
  0x26   : > { %1935 = vmatmul.msk.bf16.gmra.mxu0 %vm360_vm0, %v1958_v6  ;;  %1939 = vmatmul.msk.bf16.gmra.mxu1 %vm360_vm0, %v1962_v7 }
  0x27   : > { %1943 = vmatmul.msk.bf16.gmra.mxu2 %vm360_vm0, %v1966_v8  ;;  %1947 = vmatmul.msk.bf16.gmra.mxu3 %vm360_vm0, %v1970_v9 }
  0x36   : > { %1936 = vmatmul.msk.bf16.gmra.mxu0 %vm360_vm0, %v1959_v10  ;;  %1940 = vmatmul.msk.bf16.gmra.mxu1 %vm360_vm0, %v1963_v11 }
  0x37   : > { %1944 = vmatmul.msk.bf16.gmra.mxu2 %vm360_vm0, %v1967_v12  ;;  %1948 = vmatmul.msk.bf16.gmra.mxu3 %vm360_vm0, %v1971_v13 }
  0x46   : > { %1937 = vmatmul.msk.bf16.gmra.mxu0 %vm360_vm0, %v1960_v14  ;;  %1941 = vmatmul.msk.bf16.gmra.mxu1 %vm360_vm0, %v1964_v15 }
  0x47   : > { %1945 = vmatmul.msk.bf16.gmra.mxu2 %vm360_vm0, %v1968_v16  ;;  %1949 = vmatmul.msk.bf16.gmra.mxu3 %vm360_vm0, %v1972_v17 }
  0x93   : > { %v418_v19 = vpop.f32.mrf.mxu0  ;;  %v438_v20 = vpop.f32.mrf.mxu1 }
  0x94   : > { %v2405_v21 = vadd.f32 %v2402_v18, %v418_v19  ;;  %v2408_v22 = vadd.f32 %v2402_v18, %v438_v20  ;;  %v2279_v20 = vmov (%p498_p4), -inf  }
  0x95   : > { %505 = vst.msk [vmem:[#allocation2] sm:$0xff] (%p498_p4), %vm504_vm1, %v2279_v20 }
  0x96   : > { %3218 = vst [vmem:[#allocation7_spill] sm:$0xff] %v2405_v21 }
  0x97   : > { %506 = vst.msk [vmem:[#allocation2 + $0x8] sm:$0xff] (%p498_p4), %vm504_vm1, %v2279_v20 }
  0x98   : > { %507 = vst.msk [vmem:[#allocation2 + $0x10] sm:$0xff] (%p498_p4), %vm504_vm1, %v2279_v20 }
  0x99   : > { %508 = vst.msk [vmem:[#allocation2 + $0x18] sm:$0xff] (%p498_p4), %vm504_vm1, %v2279_v20 }
  0x9a   : > { %v458_v23 = vpop.f32.mrf.mxu2  ;;  %v478_v24 = vpop.f32.mrf.mxu3  ;;  %509 = vst.msk [vmem:[#allocation2 + $0x20] sm:$0xff] (%p498_p4), %vm504_vm1, %v2279_v20 }
  0x9b   : > { %v2411_v25 = vadd.f32 %v2402_v18, %v458_v23  ;;  %v2414_v26 = vadd.f32 %v2402_v18, %v478_v24  ;;  %v420_v27 = vpop.f32.mrf.mxu0  ;;  %v440_v28 = vpop.f32.mrf.mxu1  ;;  %510 = vst.msk [vmem:[#allocation2 + $0x28] sm:$0xff] (%p498_p4), %vm504_vm1, %v2279_v20 }
  0x9c   : > { %v2417_v29 = vadd.f32 %v2402_v18, %v420_v27  ;;  %v2420_v30 = vadd.f32 %v2402_v18, %v440_v28  ;;  %511 = vst.msk [vmem:[#allocation2 + $0x30] sm:$0xff] (%p498_p4), %vm504_vm1, %v2279_v20 }
  0x9d   : > { %512 = vst.msk [vmem:[#allocation2 + $0x38] sm:$0xff] (%p498_p4), %vm504_vm1, %v2279_v20 }
  0x9e   : > { %513 = vst.msk [vmem:[#allocation2 + $0x40] sm:$0xff] (%p498_p4), %vm504_vm1, %v2279_v20 }
  0x9f   : > { %514 = vst.msk [vmem:[#allocation2 + $0x48] sm:$0xff] (%p498_p4), %vm504_vm1, %v2279_v20 }
  0xa0   : > { %515 = vst.msk [vmem:[#allocation2 + $0x50] sm:$0xff] (%p498_p4), %vm504_vm1, %v2279_v20 }
  0xa1   : > { %516 = vst.msk [vmem:[#allocation2 + $0x58] sm:$0xff] (%p498_p4), %vm504_vm1, %v2279_v20 }
  0xa2   : > { %v460_v31 = vpop.f32.mrf.mxu2  ;;  %v480_v32 = vpop.f32.mrf.mxu3  ;;  %517 = vst.msk [vmem:[#allocation2 + $0x60] sm:$0xff] (%p498_p4), %vm504_vm1, %v2279_v20 }
  0xa3   : > { %v2423_v33 = vadd.f32 %v2402_v18, %v460_v31  ;;  %v2426_v34 = vadd.f32 %v2402_v18, %v480_v32  ;;  %v423_v35 = vpop.f32.mrf.mxu0  ;;  %v443_v36 = vpop.f32.mrf.mxu1  ;;  %518 = vst.msk [vmem:[#allocation2 + $0x68] sm:$0xff] (%p498_p4), %vm504_vm1, %v2279_v20 }
  0xa4   : > { %v2429_v37 = vadd.f32 %v2402_v18, %v423_v35  ;;  %v2432_v38 = vadd.f32 %v2402_v18, %v443_v36  ;;  %519 = vst.msk [vmem:[#allocation2 + $0x70] sm:$0xff] (%p498_p4), %vm504_vm1, %v2279_v20 }
  0xa5   : > { %520 = vst.msk [vmem:[#allocation2 + $0x78] sm:$0xff] (%p498_p4), %vm504_vm1, %v2279_v20 }
  0xa6   : > { %3219 = vst [vmem:[#allocation8_spill] sm:$0xff] %v2429_v37 }
  0xa7   : > { %521 = vst.msk [vmem:[#allocation2 + $0x80] sm:$0xff] (%p498_p4), %vm504_vm1, %v2279_v20 }
  0xa8   : > { %522 = vst.msk [vmem:[#allocation2 + $0x88] sm:$0xff] (%p498_p4), %vm504_vm1, %v2279_v20 }
  0xa9   : > { %523 = vst.msk [vmem:[#allocation2 + $0x90] sm:$0xff] (%p498_p4), %vm504_vm1, %v2279_v20 }
  0xaa   : > { %v463_v39 = vpop.f32.mrf.mxu2  ;;  %v483_v40 = vpop.f32.mrf.mxu3  ;;  %524 = vst.msk [vmem:[#allocation2 + $0x98] sm:$0xff] (%p498_p4), %vm504_vm1, %v2279_v20 }
  0xab   : > { %v2435_v41 = vadd.f32 %v2402_v18, %v463_v39  ;;  %v2438_v42 = vadd.f32 %v2402_v18, %v483_v40  ;;  %v425_v43 = vpop.f32.mrf.mxu0  ;;  %v445_v44 = vpop.f32.mrf.mxu1  ;;  %525 = vst.msk [vmem:[#allocation2 + $0xa0] sm:$0xff] (%p498_p4), %vm504_vm1, %v2279_v20 }
  0xac   : > { %v2441_v45 = vadd.f32 %v2402_v18, %v425_v43  ;;  %v2444_v46 = vadd.f32 %v2402_v18, %v445_v44  ;;  %526 = vst.msk [vmem:[#allocation2 + $0xa8] sm:$0xff] (%p498_p4), %vm504_vm1, %v2279_v20 }
  0xad   : > { %527 = vst.msk [vmem:[#allocation2 + $0xb0] sm:$0xff] (%p498_p4), %vm504_vm1, %v2279_v20 }
  0xae   : > { %528 = vst.msk [vmem:[#allocation2 + $0xb8] sm:$0xff] (%p498_p4), %vm504_vm1, %v2279_v20 }
  0xaf   : > { %529 = vst.msk [vmem:[#allocation2 + $0xc0] sm:$0xff] (%p498_p4), %vm504_vm1, %v2279_v20 }
  0xb0   : > { %530 = vst.msk [vmem:[#allocation2 + $0xc8] sm:$0xff] (%p498_p4), %vm504_vm1, %v2279_v20 }
  0xb1   : > { %531 = vst.msk [vmem:[#allocation2 + $0xd0] sm:$0xff] (%p498_p4), %vm504_vm1, %v2279_v20 }
  0xb2   : > { %v465_v47 = vpop.f32.mrf.mxu2  ;;  %v485_v48 = vpop.f32.mrf.mxu3  ;;  %532 = vst.msk [vmem:[#allocation2 + $0xd8] sm:$0xff] (%p498_p4), %vm504_vm1, %v2279_v20 }
  0xb3   : > { %v2447_v49 = vadd.f32 %v2402_v18, %v465_v47  ;;  %v2450_v50 = vadd.f32 %v2402_v18, %v485_v48  ;;  %v428_v51 = vpop.f32.mrf.mxu0  ;;  %v448_v52 = vpop.f32.mrf.mxu1  ;;  %533 = vst.msk [vmem:[#allocation2 + $0xe0] sm:$0xff] (%p498_p4), %vm504_vm1, %v2279_v20 }
  0xb4   : > { %v2453_v53 = vadd.f32 %v2402_v18, %v428_v51  ;;  %v2456_v54 = vadd.f32 %v2402_v18, %v448_v52  ;;  %534 = vst.msk [vmem:[#allocation2 + $0xe8] sm:$0xff] (%p498_p4), %vm504_vm1, %v2279_v20 }
  0xb5   : > { %535 = vst.msk [vmem:[#allocation2 + $0xf0] sm:$0xff] (%p498_p4), %vm504_vm1, %v2279_v20 }
  0xb6   : > { %536 = vst.msk [vmem:[#allocation2 + $0xf8] sm:$0xff] (%p498_p4), %vm504_vm1, %v2279_v20 }
  0xba   : > { %v468_v55 = vpop.f32.mrf.mxu2  ;;  %v488_v56 = vpop.f32.mrf.mxu3 }
  0xbb   : > { %v2459_v57 = vadd.f32 %v2402_v18, %v468_v55  ;;  %v2462_v58 = vadd.f32 %v2402_v18, %v488_v56  ;;  %v430_v59 = vpop.f32.mrf.mxu0  ;;  %v450_v60 = vpop.f32.mrf.mxu1 }
  0xbc   : > { %v2465_v61 = vadd.f32 %v2402_v18, %v430_v59  ;;  %v2468_v62 = vadd.f32 %v2402_v18, %v450_v60 }
  0xbe   : > { %3220 = vst [vmem:[#allocation9_spill] sm:$0xff] %v2465_v61 }
  0xc2   : > { %v470_v63 = vpop.f32.mrf.mxu2  ;;  %v490_v0 = vpop.f32.mrf.mxu3 }
  0xc3   : > { %v2471_v1 = vadd.f32 %v2402_v18, %v470_v63  ;;  %v2474_v2 = vadd.f32 %v2402_v18, %v490_v0  ;;  %v433_v3 = vpop.f32.mrf.mxu0  ;;  %v453_v4 = vpop.f32.mrf.mxu1 }
  0xc4   : > { %v2477_v5 = vadd.f32 %v2402_v18, %v433_v3  ;;  %v2480_v6 = vadd.f32 %v2402_v18, %v453_v4 }
  0xca   : > { %v473_v7 = vpop.f32.mrf.mxu2  ;;  %v493_v8 = vpop.f32.mrf.mxu3 }
  0xcb   : > { %v2483_v9 = vadd.f32 %v2402_v18, %v473_v7  ;;  %v2486_v10 = vadd.f32 %v2402_v18, %v493_v8  ;;  %v435_v11 = vpop.f32.mrf.mxu0  ;;  %v455_v12 = vpop.f32.mrf.mxu1 }
  0xcc   : > { %v2489_v13 = vadd.f32 %v2402_v18, %v435_v11  ;;  %v2492_v14 = vadd.f32 %v2402_v18, %v455_v12 }
  0xce   : > { %3221 = vst [vmem:[#allocation10_spill] sm:$0xff] %v2489_v13 }
  0xcf   : > { %503 = sbr.rel (!%p498_p4) target bundleno = 244 (0xf4), region = 36 }
  0xd2   : > { %v475_v15 = vpop.f32.mrf.mxu2  ;;  %v495_v16 = vpop.f32.mrf.mxu3 }
  0xd3   : > { %v2495_v17 = vadd.f32 %v2402_v18, %v475_v15  ;;  %v2498_v19 = vadd.f32 %v2402_v18, %v495_v16  ;;  %v2280_v18 = vmov (%p498_p4), 0.0  }
  0xd4   : > { %537 = vst.msk [vmem:[#allocation3] sm:$0xff] %vm504_vm1, %v2280_v18 }
  0xd5   : > { %538 = vst.msk [vmem:[#allocation3 + $0x8] sm:$0xff] %vm504_vm1, %v2280_v18 }
  0xd6   : > { %539 = vst.msk [vmem:[#allocation3 + $0x10] sm:$0xff] %vm504_vm1, %v2280_v18 }
  0xd7   : > { %540 = vst.msk [vmem:[#allocation3 + $0x18] sm:$0xff] %vm504_vm1, %v2280_v18 }
  0xd8   : > { %541 = vst.msk [vmem:[#allocation3 + $0x20] sm:$0xff] %vm504_vm1, %v2280_v18 }
  0xd9   : > { %542 = vst.msk [vmem:[#allocation3 + $0x28] sm:$0xff] %vm504_vm1, %v2280_v18 }
  0xda   : > { %543 = vst.msk [vmem:[#allocation3 + $0x30] sm:$0xff] %vm504_vm1, %v2280_v18 }
  0xdb   : > { %544 = vst.msk [vmem:[#allocation3 + $0x38] sm:$0xff] %vm504_vm1, %v2280_v18 }
  0xdc   : > { %545 = vst.msk [vmem:[#allocation3 + $0x40] sm:$0xff] %vm504_vm1, %v2280_v18 }
  0xdd   : > { %546 = vst.msk [vmem:[#allocation3 + $0x48] sm:$0xff] %vm504_vm1, %v2280_v18 }
  0xde   : > { %547 = vst.msk [vmem:[#allocation3 + $0x50] sm:$0xff] %vm504_vm1, %v2280_v18 }
  0xdf   : > { %548 = vst.msk [vmem:[#allocation3 + $0x58] sm:$0xff] %vm504_vm1, %v2280_v18 }
  0xe0   : > { %549 = vst.msk [vmem:[#allocation3 + $0x60] sm:$0xff] %vm504_vm1, %v2280_v18 }
  0xe1   : > { %550 = vst.msk [vmem:[#allocation3 + $0x68] sm:$0xff] %vm504_vm1, %v2280_v18 }
  0xe2   : > { %551 = vst.msk [vmem:[#allocation3 + $0x70] sm:$0xff] %vm504_vm1, %v2280_v18 }
  0xe3   : > { %552 = vst.msk [vmem:[#allocation3 + $0x78] sm:$0xff] %vm504_vm1, %v2280_v18 }
  0xe4   : > { %553 = vst.msk [vmem:[#allocation3 + $0x80] sm:$0xff] %vm504_vm1, %v2280_v18 }
  0xe5   : > { %554 = vst.msk [vmem:[#allocation3 + $0x88] sm:$0xff] %vm504_vm1, %v2280_v18 }
  0xe6   : > { %555 = vst.msk [vmem:[#allocation3 + $0x90] sm:$0xff] %vm504_vm1, %v2280_v18 }
  0xe7   : > { %556 = vst.msk [vmem:[#allocation3 + $0x98] sm:$0xff] %vm504_vm1, %v2280_v18 }
  0xe8   : > { %557 = vst.msk [vmem:[#allocation3 + $0xa0] sm:$0xff] %vm504_vm1, %v2280_v18 }
  0xe9   : > { %558 = vst.msk [vmem:[#allocation3 + $0xa8] sm:$0xff] %vm504_vm1, %v2280_v18 }
  0xea   : > { %559 = vst.msk [vmem:[#allocation3 + $0xb0] sm:$0xff] %vm504_vm1, %v2280_v18 }
  0xeb   : > { %560 = vst.msk [vmem:[#allocation3 + $0xb8] sm:$0xff] %vm504_vm1, %v2280_v18 }
  0xec   : > { %561 = vst.msk [vmem:[#allocation3 + $0xc0] sm:$0xff] %vm504_vm1, %v2280_v18 }
  0xed   : > { %562 = vst.msk [vmem:[#allocation3 + $0xc8] sm:$0xff] %vm504_vm1, %v2280_v18 }
  0xee   : > { %563 = vst.msk [vmem:[#allocation3 + $0xd0] sm:$0xff] %vm504_vm1, %v2280_v18 }
  0xef   : > { %564 = vst.msk [vmem:[#allocation3 + $0xd8] sm:$0xff] %vm504_vm1, %v2280_v18 }
  0xf0   : > { %565 = vst.msk [vmem:[#allocation3 + $0xe0] sm:$0xff] %vm504_vm1, %v2280_v18 }
  0xf1   : > { %566 = vst.msk [vmem:[#allocation3 + $0xe8] sm:$0xff] %vm504_vm1, %v2280_v18 }
  0xf2   : > { %567 = vst.msk [vmem:[#allocation3 + $0xf0] sm:$0xff] %vm504_vm1, %v2280_v18 }
  0xf3   : > { %568 = vst.msk [vmem:[#allocation3 + $0xf8] sm:$0xff] %vm504_vm1, %v2280_v18 }
  0xf4 PF: > { %p1951_p5 = scmp.ne.s32.totalorder %s2269_s12, 0 }
  0xf6   : > { %571 = sbr.rel (%p1951_p5) target bundleno = 703 (0x2bf), region = 40 }
  0xfb   : > { %612 = vmax.xlane.f32.xlu2 %v2453_v53  ;;  %608 = vmax.xlane.f32.xlu1 %v2429_v37  ;;  %v2281_v23 = vmov 0   ;;  %v2599_v24 = vld [vmem:[#allocation2 + $0x20] sm:$0xff]  ;;  %v2601_v27 = vld [vmem:[#allocation2 + $0x10] sm:$0xff]  ;;  %vm1212_vm2 = vcmask 7168   ;;  %v2628_v48 = vld [vmem:[#allocation2 + $0x28] sm:$0xff] }
  0xfc   : > { %604 = vmax.xlane.f32.xlu0 %v2405_v21  ;;  %2027 = vset.pattern.permute.xlu1 %v2281_v23  ;;  %v2603_v28 = vld [vmem:[#allocation2] sm:$0xff]  ;;  %v2630_v51 = vld [vmem:[#allocation2 + $0x18] sm:$0xff]  ;;  %v2632_v52 = vld [vmem:[#allocation2 + $0x8] sm:$0xff] }
  0xfd   : > { %2025 = vset.pattern.permute.xlu2 %v2281_v23  ;;  %2026 = vset.pattern.permute.xlu0 %v2281_v23  ;;  %v2658_v8 = vld [vmem:[#allocation2 + $0x40] sm:$0xff]  ;;  %v2660_v11 = vld [vmem:[#allocation2 + $0x38] sm:$0xff]  ;;  %v2662_v12 = vld [vmem:[#allocation2 + $0x30] sm:$0xff] }
  0xfe   : > { %v2722_v7 = vld [vmem:[#allocation2 + $0x60] sm:$0xff] }
  0xff   : > { %3231 = vst [vmem:[#allocation20_spill] sm:$0xff] %v2722_v7 }
 0x103   : > { %614 = vmax.xlane.f32.xlu2 %v2465_v61  ;;  %610 = vmax.xlane.f32.xlu1 %v2441_v45 }
 0x104   : > { %606 = vmax.xlane.f32.xlu0 %v2417_v29 }
 0x10b   : > { %620 = vmax.xlane.f32.xlu2 %v2408_v22  ;;  %618 = vmax.xlane.f32.xlu1 %v2489_v13 }
 0x10c   : > { %616 = vmax.xlane.f32.xlu0 %v2477_v5 }
 0x113   : > { %626 = vmax.xlane.f32.xlu2 %v2444_v46  ;;  %624 = vmax.xlane.f32.xlu1 %v2432_v38 }
 0x114   : > { %622 = vmax.xlane.f32.xlu0 %v2420_v30 }
 0x11b   : > { %632 = vmax.xlane.f32.xlu2 %v2480_v6  ;;  %630 = vmax.xlane.f32.xlu1 %v2468_v62 }
 0x11c   : > { %628 = vmax.xlane.f32.xlu0 %v2456_v54 }
 0x123   : > { %638 = vmax.xlane.f32.xlu2 %v2423_v33  ;;  %636 = vmax.xlane.f32.xlu1 %v2411_v25 }
 0x124   : > { %634 = vmax.xlane.f32.xlu0 %v2492_v14 }
 0x12b   : > { %644 = vmax.xlane.f32.xlu2 %v2459_v57  ;;  %642 = vmax.xlane.f32.xlu1 %v2447_v49 }
 0x12c   : > { %640 = vmax.xlane.f32.xlu0 %v2435_v41 }
 0x133   : > { %650 = vmax.xlane.f32.xlu2 %v2495_v17  ;;  %648 = vmax.xlane.f32.xlu1 %v2483_v9 }
 0x134   : > { %646 = vmax.xlane.f32.xlu0 %v2471_v1 }
 0x13b   : > { %656 = vmax.xlane.f32.xlu2 %v2438_v42  ;;  %654 = vmax.xlane.f32.xlu1 %v2426_v34 }
 0x13c   : > { %652 = vmax.xlane.f32.xlu0 %v2414_v26 }
 0x143   : > { %662 = vmax.xlane.f32.xlu2 %v2474_v2  ;;  %660 = vmax.xlane.f32.xlu1 %v2462_v58 }
 0x144   : > { %658 = vmax.xlane.f32.xlu0 %v2450_v50 }
 0x14b   : > { %666 = vmax.xlane.f32.xlu1 %v2498_v19 }
 0x14c   : > { %664 = vmax.xlane.f32.xlu0 %v2486_v10 }
 0x16e   : > { %v613_v31 = vpop.xlane.xlu2 %612  ;;  %v609_v32 = vpop.xlane.xlu1 %608 }
 0x16f   : > { %v2606_v35 = vmax.f32 %v2599_v24, %v613_v31  ;;  %v2609_v36 = vmax.f32 %v2601_v27, %v609_v32  ;;  %v605_v39 = vpop.xlane.xlu0 %604 }
 0x170   : > { %v2612_v40 = vmax.f32 %v2603_v28, %v605_v39 }
 0x171   : > { %1249 = vst.msk [vmem:[#allocation2 + $0x20] sm:$0xff] %vm1212_vm2, %v2606_v35  ;;  %872 = vperm.xlu1 %2027, %v2609_v36  }
 0x172   : > { %1247 = vst.msk [vmem:[#allocation2 + $0x10] sm:$0xff] %vm1212_vm2, %v2609_v36  ;;  %862 = vperm.xlu2 %2025, %v2612_v40  }
 0x173   : > { %1245 = vst.msk [vmem:[#allocation2] sm:$0xff] %vm1212_vm2, %v2612_v40 }
 0x176   : > { %v615_v55 = vpop.xlane.xlu2 %614  ;;  %v611_v56 = vpop.xlane.xlu1 %610 }
 0x177   : > { %v2635_v59 = vmax.f32 %v2628_v48, %v615_v55  ;;  %v2638_v60 = vmax.f32 %v2630_v51, %v611_v56  ;;  %v607_v63 = vpop.xlane.xlu0 %606  ;;  %v2688_v56 = vld [vmem:[#allocation2 + $0x58] sm:$0xff] }
 0x178   : > { %v2641_v0 = vmax.f32 %v2632_v52, %v607_v63  ;;  %3223 = vst [vmem:[#allocation12_spill] sm:$0xff] %v2688_v56  ;;  %v2690_v63 = vld [vmem:[#allocation2 + $0x50] sm:$0xff] }
 0x179   : > { %1250 = vst.msk [vmem:[#allocation2 + $0x28] sm:$0xff] %vm1212_vm2, %v2635_v59  ;;  %887 = vperm.xlu1 %2027, %v2635_v59  }
 0x17a   : > { %1248 = vst.msk [vmem:[#allocation2 + $0x18] sm:$0xff] %vm1212_vm2, %v2638_v60  ;;  %867 = vperm.xlu0 %2026, %v2641_v0   ;;  %877 = vperm.xlu2 %2025, %v2638_v60  }
 0x17b   : > { %1246 = vst.msk [vmem:[#allocation2 + $0x8] sm:$0xff] %vm1212_vm2, %v2641_v0 }
 0x17c   : > { %3224 = vst [vmem:[#allocation13_spill] sm:$0xff] %v2690_v63 }
 0x17e   : > { %v621_v15 = vpop.xlane.xlu2 %620  ;;  %v619_v16 = vpop.xlane.xlu1 %618 }
 0x17f   : > { %v2665_v20 = vmax.f32 %v2658_v8, %v621_v15  ;;  %v2668_v18 = vmax.f32 %v2660_v11, %v619_v16  ;;  %v617_v23 = vpop.xlane.xlu0 %616  ;;  %v2692_v15 = vld [vmem:[#allocation2 + $0x48] sm:$0xff] }
 0x180   : > { %v2671_v31 = vmax.f32 %v2662_v12, %v617_v23  ;;  %3225 = vst [vmem:[#allocation14_spill] sm:$0xff] %v2692_v15 }
 0x181   : > { %1253 = vst.msk [vmem:[#allocation2 + $0x40] sm:$0xff] %vm1212_vm2, %v2665_v20  ;;  %897 = vperm.xlu1 %2027, %v2668_v18  }
 0x182   : > { %3222 = vst [vmem:[#allocation11_spill] sm:$0xff] %v2671_v31  ;;  %902 = vperm.xlu0 %2026, %v2665_v20   ;;  %882 = vperm.xlu2 %2025, %v2606_v35  }
 0x183   : > { %1252 = vst.msk [vmem:[#allocation2 + $0x38] sm:$0xff] %vm1212_vm2, %v2668_v18 }
 0x184   : > { %1251 = vst.msk [vmem:[#allocation2 + $0x30] sm:$0xff] %vm1212_vm2, %v2671_v31 }
 0x186   : > { %v627_v16 = vpop.xlane.xlu2 %626  ;;  %v625_v23 = vpop.xlane.xlu1 %624 }
 0x187   : > { %v2695_v32 = vmax.f32 %v2688_v56, %v627_v16  ;;  %v2698_v39 = vmax.f32 %v2690_v63, %v625_v23  ;;  %v623_v4 = vpop.xlane.xlu0 %622  ;;  %v2718_v16 = vld [vmem:[#allocation2 + $0x70] sm:$0xff]  ;;  %v2720_v23 = vld [vmem:[#allocation2 + $0x68] sm:$0xff] }
 0x188   : > { %v2701_v55 = vmax.f32 %v2692_v15, %v623_v4  ;;  %3229 = vst [vmem:[#allocation18_spill] sm:$0xff] %v2718_v16  ;;  %v2752_v15 = vld [vmem:[#allocation2 + $0x78] sm:$0xff] }
 0x189   : > { %3226 = vst [vmem:[#allocation15_spill] sm:$0xff] %v2695_v32  ;;  %912 = vperm.xlu1 %2027, %v2698_v39  }
 0x18a   : > { %3227 = vst [vmem:[#allocation16_spill] sm:$0xff] %v2698_v39  ;;  %917 = vperm.xlu0 %2026, %v2695_v32   ;;  %892 = vperm.xlu2 %2025, %v2671_v31  }
 0x18b   : > { %3228 = vst [vmem:[#allocation17_spill] sm:$0xff] %v2701_v55 }
 0x18c   : > { %1256 = vst.msk [vmem:[#allocation2 + $0x58] sm:$0xff] %vm1212_vm2, %v2695_v32 }
 0x18d   : > { %1255 = vst.msk [vmem:[#allocation2 + $0x50] sm:$0xff] %vm1212_vm2, %v2698_v39 }
 0x18e   : > { %1254 = vst.msk [vmem:[#allocation2 + $0x48] sm:$0xff] %vm1212_vm2, %v2701_v55  ;;  %v633_v3 = vpop.xlane.xlu2 %632  ;;  %v631_v44 = vpop.xlane.xlu1 %630 }
 0x18f   : > { %3230 = vst [vmem:[#allocation19_spill] sm:$0xff] %v2720_v23  ;;  %v2725_v43 = vmax.f32 %v2718_v16, %v633_v3  ;;  %v2728_v47 = vmax.f32 %v2720_v23, %v631_v44  ;;  %v629_v32 = vpop.xlane.xlu0 %628  ;;  %v2748_v3 = vld [vmem:[#allocation2 + $0x88] sm:$0xff] }
 0x190   : > { %v2731_v4 = vmax.f32 %v2722_v7, %v629_v32  ;;  %3235 = vst [vmem:[#allocation24_spill] sm:$0xff] %v2748_v3  ;;  %v2750_v32 = vld [vmem:[#allocation2 + $0x80] sm:$0xff]  ;;  %v2782_v7 = vld [vmem:[#allocation2 + $0x90] sm:$0xff] }
 0x191   : > { %3232 = vst [vmem:[#allocation21_spill] sm:$0xff] %v2725_v43  ;;  %927 = vperm.xlu1 %2027, %v2728_v47  }
 0x192   : > { %3233 = vst [vmem:[#allocation22_spill] sm:$0xff] %v2728_v47  ;;  %932 = vperm.xlu0 %2026, %v2725_v43   ;;  %907 = vperm.xlu2 %2025, %v2701_v55  }
 0x193   : > { %3234 = vst [vmem:[#allocation23_spill] sm:$0xff] %v2731_v4 }
 0x194   : > { %1259 = vst.msk [vmem:[#allocation2 + $0x70] sm:$0xff] %vm1212_vm2, %v2725_v43 }
 0x195   : > { %1258 = vst.msk [vmem:[#allocation2 + $0x68] sm:$0xff] %vm1212_vm2, %v2728_v47 }
 0x196   : > { %1257 = vst.msk [vmem:[#allocation2 + $0x60] sm:$0xff] %vm1212_vm2, %v2731_v4  ;;  %v639_v56 = vpop.xlane.xlu2 %638  ;;  %v637_v16 = vpop.xlane.xlu1 %636 }
 0x197   : > { %3236 = vst [vmem:[#allocation25_spill] sm:$0xff] %v2750_v32  ;;  %v2755_v47 = vmax.f32 %v2748_v3, %v639_v56  ;;  %v2758_v43 = vmax.f32 %v2750_v32, %v637_v16  ;;  %v635_v23 = vpop.xlane.xlu0 %634  ;;  %v2778_v16 = vld [vmem:[#allocation2 + $0xa0] sm:$0xff] }
 0x198   : > { %3237 = vst [vmem:[#allocation26_spill] sm:$0xff] %v2752_v15  ;;  %v2761_v44 = vmax.f32 %v2752_v15, %v635_v23  ;;  %v2780_v23 = vld [vmem:[#allocation2 + $0x98] sm:$0xff]  ;;  %v2812_v15 = vld [vmem:[#allocation2 + $0xa8] sm:$0xff] }
 0x199   : > { %3238 = vst [vmem:[#allocation27_spill] sm:$0xff] %v2755_v47  ;;  %942 = vperm.xlu1 %2027, %v2758_v43  }
 0x19a   : > { %3239 = vst [vmem:[#allocation28_spill] sm:$0xff] %v2758_v43  ;;  %947 = vperm.xlu0 %2026, %v2755_v47   ;;  %922 = vperm.xlu2 %2025, %v2731_v4  }
 0x19b   : > { %3240 = vst [vmem:[#allocation29_spill] sm:$0xff] %v2761_v44 }
 0x19c   : > { %1262 = vst.msk [vmem:[#allocation2 + $0x88] sm:$0xff] %vm1212_vm2, %v2755_v47 }
 0x19d   : > { %1261 = vst.msk [vmem:[#allocation2 + $0x80] sm:$0xff] %vm1212_vm2, %v2758_v43 }
 0x19e   : > { %1260 = vst.msk [vmem:[#allocation2 + $0x78] sm:$0xff] %vm1212_vm2, %v2761_v44  ;;  %v645_v55 = vpop.xlane.xlu2 %644  ;;  %v643_v3 = vpop.xlane.xlu1 %642 }
 0x19f   : > { %3241 = vst [vmem:[#allocation30_spill] sm:$0xff] %v2778_v16  ;;  %v2785_v43 = vmax.f32 %v2778_v16, %v645_v55  ;;  %v2788_v47 = vmax.f32 %v2780_v23, %v643_v3  ;;  %v641_v32 = vpop.xlane.xlu0 %640  ;;  %v2808_v3 = vld [vmem:[#allocation2 + $0xb8] sm:$0xff] }
 0x1a0   : > { %3242 = vst [vmem:[#allocation31_spill] sm:$0xff] %v2780_v23  ;;  %v2791_v56 = vmax.f32 %v2782_v7, %v641_v32  ;;  %v2810_v32 = vld [vmem:[#allocation2 + $0xb0] sm:$0xff] }
 0x1a1   : > { %3243 = vst [vmem:[#allocation32_spill] sm:$0xff] %v2782_v7  ;;  %957 = vperm.xlu1 %2027, %v2788_v47   ;;  %v2842_v7 = vld [vmem:[#allocation2 + $0xc0] sm:$0xff] }
 0x1a2   : > { %3244 = vst [vmem:[#allocation33_spill] sm:$0xff] %v2785_v43  ;;  %962 = vperm.xlu0 %2026, %v2785_v43   ;;  %937 = vperm.xlu2 %2025, %v2761_v44  }
 0x1a3   : > { %3245 = vst [vmem:[#allocation34_spill] sm:$0xff] %v2788_v47 }
 0x1a4   : > { %3246 = vst [vmem:[#allocation35_spill] sm:$0xff] %v2791_v56 }
 0x1a5   : > { %1265 = vst.msk [vmem:[#allocation2 + $0xa0] sm:$0xff] %vm1212_vm2, %v2785_v43 }
 0x1a6   : > { %1264 = vst.msk [vmem:[#allocation2 + $0x98] sm:$0xff] %vm1212_vm2, %v2788_v47  ;;  %v651_v4 = vpop.xlane.xlu2 %650  ;;  %v649_v16 = vpop.xlane.xlu1 %648 }
 0x1a7   : > { %1263 = vst.msk [vmem:[#allocation2 + $0x90] sm:$0xff] %vm1212_vm2, %v2791_v56  ;;  %v2815_v47 = vmax.f32 %v2808_v3, %v651_v4  ;;  %v2818_v43 = vmax.f32 %v2810_v32, %v649_v16  ;;  %v647_v23 = vpop.xlane.xlu0 %646  ;;  %v2838_v16 = vld [vmem:[#allocation2 + $0xd0] sm:$0xff] }
 0x1a8   : > { %3247 = vst [vmem:[#allocation36_spill] sm:$0xff] %v2808_v3  ;;  %v2821_v55 = vmax.f32 %v2812_v15, %v647_v23  ;;  %v2840_v23 = vld [vmem:[#allocation2 + $0xc8] sm:$0xff] }
 0x1a9   : > { %3248 = vst [vmem:[#allocation37_spill] sm:$0xff] %v2810_v32  ;;  %972 = vperm.xlu1 %2027, %v2818_v43  }
 0x1aa   : > { %3249 = vst [vmem:[#allocation38_spill] sm:$0xff] %v2812_v15  ;;  %977 = vperm.xlu0 %2026, %v2815_v47   ;;  %952 = vperm.xlu2 %2025, %v2791_v56   ;;  %v2872_v15 = vld [vmem:[#allocation2 + $0xd8] sm:$0xff] }
 0x1ab   : > { %3250 = vst [vmem:[#allocation39_spill] sm:$0xff] %v2815_v47 }
 0x1ac   : > { %3251 = vst [vmem:[#allocation40_spill] sm:$0xff] %v2818_v43 }
 0x1ad   : > { %3252 = vst [vmem:[#allocation41_spill] sm:$0xff] %v2821_v55 }
 0x1ae   : > { %1268 = vst.msk [vmem:[#allocation2 + $0xb8] sm:$0xff] %vm1212_vm2, %v2815_v47  ;;  %v657_v44 = vpop.xlane.xlu2 %656  ;;  %v655_v3 = vpop.xlane.xlu1 %654 }
 0x1af   : > { %1267 = vst.msk [vmem:[#allocation2 + $0xb0] sm:$0xff] %vm1212_vm2, %v2818_v43  ;;  %v2845_v43 = vmax.f32 %v2838_v16, %v657_v44  ;;  %v2848_v47 = vmax.f32 %v2840_v23, %v655_v3  ;;  %v653_v32 = vpop.xlane.xlu0 %652  ;;  %v2868_v3 = vld [vmem:[#allocation2 + $0xe8] sm:$0xff] }
 0x1b0   : > { %1266 = vst.msk [vmem:[#allocation2 + $0xa8] sm:$0xff] %vm1212_vm2, %v2821_v55  ;;  %v2851_v4 = vmax.f32 %v2842_v7, %v653_v32  ;;  %v2870_v32 = vld [vmem:[#allocation2 + $0xe0] sm:$0xff] }
 0x1b1   : > { %3253 = vst [vmem:[#allocation42_spill] sm:$0xff] %v2838_v16  ;;  %987 = vperm.xlu1 %2027, %v2848_v47  }
 0x1b2   : > { %3254 = vst [vmem:[#allocation43_spill] sm:$0xff] %v2840_v23  ;;  %992 = vperm.xlu0 %2026, %v2845_v43   ;;  %967 = vperm.xlu2 %2025, %v2821_v55  }
 0x1b3   : > { %3255 = vst [vmem:[#allocation44_spill] sm:$0xff] %v2842_v7 }
 0x1b4   : > { %3256 = vst [vmem:[#allocation45_spill] sm:$0xff] %v2845_v43 }
 0x1b5   : > { %3257 = vst [vmem:[#allocation46_spill] sm:$0xff] %v2848_v47 }
 0x1b6   : > { %3258 = vst [vmem:[#allocation47_spill] sm:$0xff] %v2851_v4  ;;  %v663_v56 = vpop.xlane.xlu2 %662  ;;  %v661_v16 = vpop.xlane.xlu1 %660 }
 0x1b7   : > { %1271 = vst.msk [vmem:[#allocation2 + $0xd0] sm:$0xff] %vm1212_vm2, %v2845_v43  ;;  %v2878_v43 = vmax.f32 %v2870_v32, %v661_v16  ;;  %v659_v23 = vpop.xlane.xlu0 %658  ;;  %v2898_v16 = vld [vmem:[#allocation2 + $0xf8] sm:$0xff] }
 0x1b8   : > { %1270 = vst.msk [vmem:[#allocation2 + $0xc8] sm:$0xff] %vm1212_vm2, %v2848_v47  ;;  %v2875_v47 = vmax.f32 %v2868_v3, %v663_v56  ;;  %v2881_v44 = vmax.f32 %v2872_v15, %v659_v23  ;;  %v2900_v23 = vld [vmem:[#allocation2 + $0xf0] sm:$0xff] }
 0x1b9   : > { %1269 = vst.msk [vmem:[#allocation2 + $0xc0] sm:$0xff] %vm1212_vm2, %v2851_v4  ;;  %1002 = vperm.xlu1 %2027, %v2878_v43  }
 0x1ba   : > { %3259 = vst [vmem:[#allocation48_spill] sm:$0xff] %v2868_v3  ;;  %1007 = vperm.xlu0 %2026, %v2875_v47   ;;  %982 = vperm.xlu2 %2025, %v2851_v4  }
 0x1bb   : > { %3260 = vst [vmem:[#allocation49_spill] sm:$0xff] %v2870_v32 }
 0x1bc   : > { %3261 = vst [vmem:[#allocation50_spill] sm:$0xff] %v2872_v15 }
 0x1bd   : > { %3262 = vst [vmem:[#allocation51_spill] sm:$0xff] %v2875_v47 }
 0x1be   : > { %3263 = vst [vmem:[#allocation52_spill] sm:$0xff] %v2878_v43  ;;  %v667_v7 = vpop.xlane.xlu1 %666 }
 0x1bf   : > { %3264 = vst [vmem:[#allocation53_spill] sm:$0xff] %v2881_v44  ;;  %v2903_v55 = vmax.f32 %v2898_v16, %v667_v7  ;;  %v665_v3 = vpop.xlane.xlu0 %664 }
 0x1c0   : > { %1274 = vst.msk [vmem:[#allocation2 + $0xe8] sm:$0xff] %vm1212_vm2, %v2875_v47 }
 0x1c1   : > { %1273 = vst.msk [vmem:[#allocation2 + $0xe0] sm:$0xff] %vm1212_vm2, %v2878_v43  ;;  %v2906_v43 = vmax.f32 %v2900_v23, %v665_v3  ;;  %1017 = vperm.xlu1 %2027, %v2903_v55  }
 0x1c2   : > { %1272 = vst.msk [vmem:[#allocation2 + $0xd8] sm:$0xff] %vm1212_vm2, %v2881_v44  ;;  %997 = vperm.xlu2 %2025, %v2881_v44  }
 0x1c3   : > { %3265 = vst [vmem:[#allocation54_spill] sm:$0xff] %v2898_v16 }
 0x1c4   : > { %3266 = vst [vmem:[#allocation55_spill] sm:$0xff] %v2900_v23 }
 0x1c5   : > { %3267 = vst [vmem:[#allocation56_spill] sm:$0xff] %v2903_v55 }
 0x1c6   : > { %3268 = vst [vmem:[#allocation57_spill] sm:$0xff] %v2906_v43 }
 0x1c7   : > { %1276 = vst.msk [vmem:[#allocation2 + $0xf8] sm:$0xff] %vm1212_vm2, %v2903_v55 }
 0x1c8   : > { %1275 = vst.msk [vmem:[#allocation2 + $0xf0] sm:$0xff] %vm1212_vm2, %v2906_v43 }
 0x1ca   : > { %1012 = vperm.xlu2 %2025, %v2906_v43  }
 0x1cc   : > { %v863_v7 = vpop.permute.xlu2 %862 }
 0x1cd   : > { %v1020_v15 = vsub.f32 %v2405_v21, %v863_v7 }
 0x1cf   : > { %v1052_v47 = vmul.f32 1.442695, %v1020_v15 }
 0x1d1   : > { %2028 = vpow2.f32 %v1052_v47 }
 0x1d4   : > { %v878_v3 = vpop.permute.xlu2 %877 }
 0x1d7   : > { %v2029_v4 = vpop.eup %2028 }
 0x1dc   : > { %v883_v16 = vpop.permute.xlu2 %882 }
 0x1dd   : > { %v1024_v32 = vsub.f32 %v2453_v53, %v883_v16 }
 0x1df   : > { %v1060_v55 = vmul.f32 1.442695, %v1024_v32  ;;  %v1023_v32 = vsub.f32 %v2441_v45, %v878_v3 }
 0x1e1   : > { %2030 = vpow2.f32 %v1060_v55 }
 0x1e3   : > { %v873_v44 = vpop.permute.xlu1 %872 }
 0x1e4   : > { %v1022_v39 = vsub.f32 %v2429_v37, %v873_v44  ;;  %1116 = vadd.xlane.f32.xlu0 %v2029_v4  ;;  %v893_v23 = vpop.permute.xlu2 %892 }
 0x1e6   : > { %v1056_v56 = vmul.f32 1.442695, %v1022_v39  ;;  %v1058_v39 = vmul.f32 1.442695, %v1023_v32 }
 0x1e7   : > { %v2031_v43 = vpop.eup %2030 }
 0x1e8   : > { %2032 = vpow2.f32 %v1056_v56 }
 0x1eb   : > { %v888_v63 = vpop.permute.xlu1 %887 }
 0x1ec   : > { %v1025_v31 = vsub.f32 %v2465_v61, %v888_v63  ;;  %v868_v7 = vpop.permute.xlu0 %867  ;;  %1124 = vadd.xlane.f32.xlu0 %v2031_v43  ;;  %v908_v4 = vpop.permute.xlu2 %907 }
 0x1ed   : > { %v1021_v47 = vsub.f32 %v2417_v29, %v868_v7 }
 0x1ee   : > { %v2033_v15 = vpop.eup %2032  ;;  %v1062_v16 = vmul.f32 1.442695, %v1025_v31  ;;  %v1026_v31 = vsub.f32 %v2477_v5, %v893_v23  ;;  %v1029_v23 = vsub.f32 %v2420_v30, %v908_v4 }
 0x1ef   : > { %v1054_v21 = vmul.f32 1.442695, %v1021_v47  ;;  %1120 = vadd.xlane.f32.xlu1 %v2033_v15 }
 0x1f0   : > { %2034 = vpow2.f32 %v1062_v16 }
 0x1f1   : > { %2036 = vpow2.f32 %v1054_v21  ;;  %v1064_v21 = vmul.f32 1.442695, %v1026_v31 }
 0x1f2   : > { %2038 = vpow2.f32 %v1058_v39 }
 0x1f3   : > { %v898_v55 = vpop.permute.xlu1 %897 }
 0x1f4   : > { %v1027_v44 = vsub.f32 %v2489_v13, %v898_v55  ;;  %v903_v56 = vpop.permute.xlu0 %902  ;;  %v923_v3 = vpop.permute.xlu2 %922 }
 0x1f5   : > { %v1028_v63 = vsub.f32 %v2408_v22, %v903_v56  ;;  %v1032_v4 = vsub.f32 %v2456_v54, %v923_v3 }
 0x1f6   : > { %v2035_v37 = vpop.eup %2034  ;;  %v1066_v43 = vmul.f32 1.442695, %v1027_v44 }
 0x1f7   : > { %v2037_v61 = vpop.eup %2036  ;;  %v1068_v7 = vmul.f32 1.442695, %v1028_v63  ;;  %1126 = vadd.xlane.f32.xlu1 %v2035_v37  ;;  %v1070_v37 = vmul.f32 1.442695, %v1029_v23 }
 0x1f8   : > { %2040 = vpow2.f32 %v1066_v43  ;;  %1118 = vadd.xlane.f32.xlu2 %v2037_v61  ;;  %v2039_v32 = vpop.eup %2038 }
 0x1f9   : > { %2042 = vpow2.f32 %v1068_v7 }
 0x1fa   : > { %2044 = vpow2.f32 %v1064_v21 }
 0x1fb   : > { %v913_v47 = vpop.permute.xlu1 %912 }
 0x1fc   : > { %v1030_v15 = vsub.f32 %v2432_v38, %v913_v47  ;;  %v918_v16 = vpop.permute.xlu0 %917  ;;  %v938_v63 = vpop.permute.xlu2 %937 }
 0x1fd   : > { %v1031_v55 = vsub.f32 %v2444_v46, %v918_v16  ;;  %v1035_v3 = vsub.f32 %v2492_v14, %v938_v63 }
 0x1fe   : > { %v2041_v56 = vpop.eup %2040  ;;  %v1072_v44 = vmul.f32 1.442695, %v1030_v15 }
 0x1ff   : > { %v2043_v13 = vpop.eup %2042  ;;  %v1074_v39 = vmul.f32 1.442695, %v1031_v55  ;;  %1130 = vadd.xlane.f32.xlu0 %v2041_v56 }
 0x200   : > { %2046 = vpow2.f32 %v1072_v44  ;;  %1132 = vadd.xlane.f32.xlu1 %v2043_v13  ;;  %1122 = vadd.xlane.f32.xlu2 %v2039_v32  ;;  %v2045_v7 = vpop.eup %2044  ;;  %v1076_v13 = vmul.f32 1.442695, %v1032_v4 }
 0x201   : > { %2048 = vpow2.f32 %v1074_v39 }
 0x202   : > { %2050 = vpow2.f32 %v1070_v37 }
 0x203   : > { %v928_v61 = vpop.permute.xlu1 %927 }
 0x204   : > { %v1033_v43 = vsub.f32 %v2468_v62, %v928_v61  ;;  %v933_v31 = vpop.permute.xlu0 %932 }
 0x205   : > { %v1034_v47 = vsub.f32 %v2480_v6, %v933_v31 }
 0x206   : > { %v2047_v15 = vpop.eup %2046  ;;  %v1078_v16 = vmul.f32 1.442695, %v1033_v43  ;;  %v953_v43 = vpop.permute.xlu2 %952 }
 0x207   : > { %v2049_v21 = vpop.eup %2048  ;;  %v1080_v55 = vmul.f32 1.442695, %v1034_v47  ;;  %1136 = vadd.xlane.f32.xlu0 %v2047_v15  ;;  %v1038_v63 = vsub.f32 %v2435_v41, %v953_v43 }
 0x208   : > { %2052 = vpow2.f32 %v1078_v16  ;;  %1138 = vadd.xlane.f32.xlu1 %v2049_v21  ;;  %1128 = vadd.xlane.f32.xlu2 %v2045_v7  ;;  %v2051_v23 = vpop.eup %2050  ;;  %v1082_v7 = vmul.f32 1.442695, %v1035_v3 }
 0x209   : > { %2054 = vpow2.f32 %v1080_v55 }
 0x20a   : > { %2056 = vpow2.f32 %v1076_v13 }
 0x20b   : > { %v943_v32 = vpop.permute.xlu1 %942 }
 0x20c   : > { %v1036_v56 = vsub.f32 %v2411_v25, %v943_v32  ;;  %v948_v44 = vpop.permute.xlu0 %947 }
 0x20d   : > { %v1037_v39 = vsub.f32 %v2423_v33, %v948_v44 }
 0x20e   : > { %v2053_v61 = vpop.eup %2052  ;;  %v1084_v31 = vmul.f32 1.442695, %v1036_v56 }
 0x20f   : > { %v2055_v37 = vpop.eup %2054  ;;  %v1086_v47 = vmul.f32 1.442695, %v1037_v39  ;;  %1142 = vadd.xlane.f32.xlu0 %v2053_v61  ;;  %v968_v39 = vpop.permute.xlu2 %967 }
 0x210   : > { %2058 = vpow2.f32 %v1084_v31  ;;  %1144 = vadd.xlane.f32.xlu1 %v2055_v37  ;;  %1134 = vadd.xlane.f32.xlu2 %v2051_v23  ;;  %v2057_v4 = vpop.eup %2056  ;;  %v1088_v23 = vmul.f32 1.442695, %v1038_v63  ;;  %v1041_v43 = vsub.f32 %v2471_v1, %v968_v39 }
 0x211   : > { %2060 = vpow2.f32 %v1086_v47 }
 0x212   : > { %2062 = vpow2.f32 %v1082_v7 }
 0x213   : > { %v958_v15 = vpop.permute.xlu1 %957 }
 0x214   : > { %v1039_v16 = vsub.f32 %v2447_v49, %v958_v15  ;;  %v963_v21 = vpop.permute.xlu0 %962 }
 0x215   : > { %v1040_v55 = vsub.f32 %v2459_v57, %v963_v21 }
 0x216   : > { %v2059_v32 = vpop.eup %2058  ;;  %v1090_v56 = vmul.f32 1.442695, %v1039_v16 }
 0x217   : > { %v2061_v44 = vpop.eup %2060  ;;  %v1092_v13 = vmul.f32 1.442695, %v1040_v55  ;;  %1148 = vadd.xlane.f32.xlu0 %v2059_v32  ;;  %v1094_v55 = vmul.f32 1.442695, %v1041_v43 }
 0x218   : > { %2064 = vpow2.f32 %v1090_v56  ;;  %1150 = vadd.xlane.f32.xlu1 %v2061_v44  ;;  %1140 = vadd.xlane.f32.xlu2 %v2057_v4  ;;  %v2063_v3 = vpop.eup %2062  ;;  %v983_v4 = vpop.permute.xlu2 %982 }
 0x219   : > { %2066 = vpow2.f32 %v1092_v13  ;;  %v1044_v39 = vsub.f32 %v2414_v26, %v983_v4 }
 0x21a   : > { %2068 = vpow2.f32 %v1088_v23 }
 0x21b   : > { %v973_v61 = vpop.permute.xlu1 %972 }
 0x21c   : > { %v1042_v31 = vsub.f32 %v2483_v9, %v973_v61  ;;  %v978_v37 = vpop.permute.xlu0 %977 }
 0x21d   : > { %v1043_v47 = vsub.f32 %v2495_v17, %v978_v37 }
 0x21e   : > { %v2065_v15 = vpop.eup %2064  ;;  %v1096_v16 = vmul.f32 1.442695, %v1042_v31 }
 0x21f   : > { %v2067_v7 = vpop.eup %2066  ;;  %v1098_v21 = vmul.f32 1.442695, %v1043_v47  ;;  %1154 = vadd.xlane.f32.xlu0 %v2065_v15 }
 0x220   : > { %2070 = vpow2.f32 %v1096_v16  ;;  %1156 = vadd.xlane.f32.xlu1 %v2067_v7  ;;  %1146 = vadd.xlane.f32.xlu2 %v2063_v3  ;;  %v2069_v63 = vpop.eup %2068  ;;  %v1100_v3 = vmul.f32 1.442695, %v1044_v39  ;;  %v998_v15 = vpop.permute.xlu2 %997 }
 0x221   : > { %2072 = vpow2.f32 %v1098_v21 }
 0x222   : > { %2074 = vpow2.f32 %v1094_v55 }
 0x223   : > { %v988_v32 = vpop.permute.xlu1 %987 }
 0x224   : > { %v1045_v56 = vsub.f32 %v2426_v34, %v988_v32  ;;  %v993_v44 = vpop.permute.xlu0 %992 }
 0x225   : > { %v1046_v13 = vsub.f32 %v2438_v42, %v993_v44  ;;  %v1047_v44 = vsub.f32 %v2450_v50, %v998_v15 }
 0x226   : > { %v2071_v61 = vpop.eup %2070  ;;  %v1102_v31 = vmul.f32 1.442695, %v1045_v56 }
 0x227   : > { %v2073_v23 = vpop.eup %2072  ;;  %v1104_v37 = vmul.f32 1.442695, %v1046_v13  ;;  %1160 = vadd.xlane.f32.xlu0 %v2071_v61 }
 0x228   : > { %2076 = vpow2.f32 %v1102_v31  ;;  %1162 = vadd.xlane.f32.xlu1 %v2073_v23  ;;  %1152 = vadd.xlane.f32.xlu2 %v2069_v63  ;;  %v2075_v43 = vpop.eup %2074  ;;  %v1106_v31 = vmul.f32 1.442695, %v1047_v44  ;;  %v1013_v39 = vpop.permute.xlu2 %1012  ;;  %v796_v44 = vld [vmem:[#allocation3] sm:$0xff] }
 0x229   : > { %2078 = vpow2.f32 %v1104_v37 }
 0x22a   : > { %2080 = vpow2.f32 %v1100_v3  ;;  %v1050_v3 = vsub.f32 %v2486_v10, %v1013_v39  ;;  %v3272_v39 = vsub.f32 %v2628_v48, %v2635_v59 }
 0x22b   : > { %v1003_v47 = vpop.permute.xlu1 %1002 }
 0x22c   : > { %v1048_v16 = vsub.f32 %v2462_v58, %v1003_v47  ;;  %v1008_v7 = vpop.permute.xlu0 %1007 }
 0x22d   : > { %v1049_v21 = vsub.f32 %v2474_v2, %v1008_v7 }
 0x22e   : > { %v2077_v32 = vpop.eup %2076  ;;  %v1108_v56 = vmul.f32 1.442695, %v1048_v16  ;;  %v1112_v16 = vmul.f32 1.442695, %v1050_v3 }
 0x22f   : > { %v2079_v55 = vpop.eup %2078  ;;  %v1110_v4 = vmul.f32 1.442695, %v1049_v21  ;;  %1166 = vadd.xlane.f32.xlu0 %v2077_v32  ;;  %v3269_v21 = vsub.f32 %v2603_v28, %v2612_v40  ;;  %v800_v40 = vld [vmem:[#allocation3 + $0x20] sm:$0xff] }
 0x230   : > { %2082 = vpow2.f32 %v1108_v56  ;;  %1168 = vadd.xlane.f32.xlu1 %v2079_v55  ;;  %1158 = vadd.xlane.f32.xlu2 %v2075_v43  ;;  %v2081_v61 = vpop.eup %2080  ;;  %v3270_v56 = vsub.f32 %v2599_v24, %v2606_v35  ;;  %v742_v24 = vmul.f32 1.442695, %v3272_v39  ;;  %v3273_v35 = vsub.f32 %v2632_v52, %v2641_v0 }
 0x231   : > { %2084 = vpow2.f32 %v1110_v4  ;;  %v732_v32 = vmul.f32 1.442695, %v3269_v21  ;;  %v3275_v52 = vsub.f32 %v2660_v11, %v2668_v18  ;;  %v3276_v21 = vsub.f32 %v2658_v8, %v2665_v20  ;;  %v3279_v8 = vld [vmem:[#allocation13_spill] sm:$0xff]  ;;  %v3280_v20 = vld [vmem:[#allocation16_spill] sm:$0xff] }
 0x232   : > { %v740_v55 = vmul.f32 1.442695, %v3270_v56 }
 0x233   : > { %v1018_v63 = vpop.permute.xlu1 %1017  ;;  %v746_v0 = vmul.f32 1.442695, %v3275_v52  ;;  %v3286_v52 = vld [vmem:[#allocation17_spill] sm:$0xff] }
 0x234   : > { %v1051_v13 = vsub.f32 %v2498_v19, %v1018_v63  ;;  %v3271_v63 = vsub.f32 %v2601_v27, %v2609_v36  ;;  %v798_v36 = vld [vmem:[#allocation3 + $0x10] sm:$0xff] }
 0x236   : > { %v2083_v23 = vpop.eup %2082  ;;  %v1114_v37 = vmul.f32 1.442695, %v1051_v13  ;;  %v736_v13 = vmul.f32 1.442695, %v3271_v63 }
 0x237   : > { %v2085_v47 = vpop.eup %2084  ;;  %1172 = vadd.xlane.f32.xlu0 %v2083_v23 }
 0x238   : > { %2086 = vpow2.f32 %v1114_v37  ;;  %1174 = vadd.xlane.f32.xlu1 %v2085_v47  ;;  %1164 = vadd.xlane.f32.xlu2 %v2081_v61  ;;  %v734_v37 = vmul.f32 1.442695, %v3273_v35  ;;  %v3283_v35 = vld [vmem:[#allocation15_spill] sm:$0xff] }
 0x239   : > { %2088 = vpow2.f32 %v1106_v31 }
 0x23a   : > { %2090 = vpow2.f32 %v1112_v16 }
 0x23b   : > { %2092 = vpow2.f32 %v732_v32  ;;  %v748_v32 = vmul.f32 1.442695, %v3276_v21 }
 0x23c   : > { %2094 = vpow2.f32 %v740_v55  ;;  %v801_v55 = vld [vmem:[#allocation3 + $0x28] sm:$0xff] }
 0x23d   : > { %2096 = vpow2.f32 %v736_v13  ;;  %v3277_v13 = vld [vmem:[#allocation11_spill] sm:$0xff] }
 0x23e   : > { %v2087_v7 = vpop.eup %2086  ;;  %2098 = vpow2.f32 %v742_v24  ;;  %v3278_v11 = vsub.f32 %v2662_v12, %v3277_v13  ;;  %v3282_v24 = vld [vmem:[#allocation12_spill] sm:$0xff] }
 0x23f   : > { %v2089_v15 = vpop.eup %2088  ;;  %1178 = vadd.xlane.f32.xlu0 %v2087_v7  ;;  %2100 = vpow2.f32 %v734_v37  ;;  %v3284_v37 = vsub.f32 %v3282_v24, %v3283_v35 }
 0x240   : > { %1170 = vadd.xlane.f32.xlu2 %v2089_v15  ;;  %v2091_v43 = vpop.eup %2090  ;;  %v744_v18 = vmul.f32 1.442695, %v3278_v11 }
 0x241   : > { %v2093_v4 = vpop.eup %2092 }
 0x242   : > { %v828_v61 = vmul.f32 %v2093_v4, %v796_v44  ;;  %v2095_v28 = vpop.eup %2094  ;;  %v797_v44 = vld [vmem:[#allocation3 + $0x8] sm:$0xff] }
 0x243   : > { %v2097_v47 = vpop.eup %2096  ;;  %v832_v27 = vmul.f32 %v2095_v28, %v800_v40 }
 0x244   : > { %v830_v7 = vmul.f32 %v2097_v47, %v798_v36  ;;  %v2099_v56 = vpop.eup %2098  ;;  %v754_v47 = vmul.f32 1.442695, %v3284_v37  ;;  %v803_v36 = vld [vmem:[#allocation3 + $0x38] sm:$0xff] }
 0x245   : > { %v2101_v4 = vpop.eup %2100 }
 0x246   : > { %v829_v63 = vmul.f32 %v2101_v4, %v797_v44  ;;  %v3288_v4 = vld [vmem:[#allocation19_spill] sm:$0xff]  ;;  %v3289_v44 = vld [vmem:[#allocation22_spill] sm:$0xff] }
 0x248   : > { %1176 = vadd.xlane.f32.xlu2 %v2091_v43  ;;  %v3274_v43 = vsub.f32 %v2630_v51, %v2638_v60  ;;  %v833_v51 = vmul.f32 %v2099_v56, %v801_v55 }
 0x24a   : > { %v738_v48 = vmul.f32 1.442695, %v3274_v43 }
 0x24c   : > { %2102 = vpow2.f32 %v738_v48 }
 0x24d   : > { %2104 = vpow2.f32 %v746_v0 }
 0x24e   : > { %2106 = vpow2.f32 %v748_v32 }
 0x24f   : > { %2108 = vpow2.f32 %v744_v18  ;;  %v3291_v18 = vld [vmem:[#allocation18_spill] sm:$0xff] }
 0x252   : > { %v2103_v39 = vpop.eup %2102 }
 0x257   : > { %v1117_v31 = vpop.xlane.xlu0 %1116 }
 0x258   : > { %v1180_v23 = vadd.f32 %v1117_v31, %v828_v61 }
 0x25a   : > { %1213 = vst.msk [vmem:[#allocation3] sm:$0xff] %vm1212_vm2, %v1180_v23  ;;  %v3281_v23 = vsub.f32 %v3279_v8, %v3280_v20 }
 0x25c   : > { %v752_v28 = vmul.f32 1.442695, %v3281_v23  ;;  %v806_v23 = vld [vmem:[#allocation3 + $0x50] sm:$0xff] }
 0x25e   : > { %2110 = vpow2.f32 %v752_v28 }
 0x25f   : > { %v1125_v3 = vpop.xlane.xlu0 %1124  ;;  %2112 = vpow2.f32 %v754_v47 }
 0x260   : > { %v1184_v16 = vadd.f32 %v1125_v3, %v832_v27  ;;  %v2105_v27 = vpop.eup %2104  ;;  %v804_v3 = vld [vmem:[#allocation3 + $0x40] sm:$0xff] }
 0x261   : > { %v2107_v12 = vpop.eup %2106 }
 0x262   : > { %1217 = vst.msk [vmem:[#allocation3 + $0x20] sm:$0xff] %vm1212_vm2, %v1184_v16  ;;  %v1121_v15 = vpop.xlane.xlu1 %1120  ;;  %v799_v16 = vld [vmem:[#allocation3 + $0x18] sm:$0xff]  ;;  %v2109_v11 = vpop.eup %2108 }
 0x263   : > { %v1182_v59 = vadd.f32 %v1121_v15, %v830_v7  ;;  %v835_v7 = vmul.f32 %v2105_v27, %v803_v36  ;;  %v836_v15 = vmul.f32 %v2107_v12, %v804_v3  ;;  %v831_v48 = vmul.f32 %v2103_v39, %v799_v16  ;;  %v802_v39 = vld [vmem:[#allocation3 + $0x30] sm:$0xff]  ;;  %v3294_v27 = vld [vmem:[#allocation20_spill] sm:$0xff]  ;;  %v3295_v36 = vld [vmem:[#allocation23_spill] sm:$0xff] }
 0x264   : > { %v2111_v20 = vpop.eup %2110  ;;  %v834_v47 = vmul.f32 %v2109_v11, %v802_v39  ;;  %v3296_v12 = vsub.f32 %v3294_v27, %v3295_v36  ;;  %v805_v11 = vld [vmem:[#allocation3 + $0x48] sm:$0xff] }
 0x265   : > { %1215 = vst.msk [vmem:[#allocation3 + $0x10] sm:$0xff] %vm1212_vm2, %v1182_v59  ;;  %v3285_v59 = vld [vmem:[#allocation14_spill] sm:$0xff]  ;;  %v2113_v28 = vpop.eup %2112  ;;  %v838_v24 = vmul.f32 %v2111_v20, %v806_v23  ;;  %v3304_v23 = vld [vmem:[#allocation29_spill] sm:$0xff] }
 0x266   : > { %v3287_v0 = vsub.f32 %v3285_v59, %v3286_v52  ;;  %v756_v3 = vmul.f32 1.442695, %v3296_v12  ;;  %v3303_v20 = vld [vmem:[#allocation26_spill] sm:$0xff] }
 0x268   : > { %v750_v21 = vmul.f32 1.442695, %v3287_v0 }
 0x26a   : > { %v1127_v60 = vpop.xlane.xlu1 %1126  ;;  %2114 = vpow2.f32 %v750_v21 }
 0x26b   : > { %v1185_v61 = vadd.f32 %v1127_v60, %v833_v51  ;;  %v1119_v31 = vpop.xlane.xlu2 %1118  ;;  %v3290_v51 = vsub.f32 %v3288_v4, %v3289_v44 }
 0x26c   : > { %v1181_v40 = vadd.f32 %v1119_v31, %v829_v63 }
 0x26d   : > { %1218 = vst.msk [vmem:[#allocation3 + $0x28] sm:$0xff] %vm1212_vm2, %v1185_v61  ;;  %v758_v60 = vmul.f32 1.442695, %v3290_v51  ;;  %v3292_v61 = vld [vmem:[#allocation21_spill] sm:$0xff] }
 0x26e   : > { %1214 = vst.msk [vmem:[#allocation3 + $0x8] sm:$0xff] %vm1212_vm2, %v1181_v40  ;;  %v3293_v31 = vsub.f32 %v3291_v18, %v3292_v61  ;;  %v807_v40 = vld [vmem:[#allocation3 + $0x58] sm:$0xff] }
 0x26f   : > { %2116 = vpow2.f32 %v758_v60  ;;  %v839_v35 = vmul.f32 %v2113_v28, %v807_v40  ;;  %v809_v60 = vld [vmem:[#allocation3 + $0x68] sm:$0xff]  ;;  %v3305_v28 = vsub.f32 %v3303_v20, %v3304_v23 }
 0x270   : > { %v760_v8 = vmul.f32 1.442695, %v3293_v31 }
 0x271   : > { %v762_v40 = vmul.f32 1.442695, %v3305_v28 }
 0x272   : > { %v1131_v43 = vpop.xlane.xlu0 %1130  ;;  %2118 = vpow2.f32 %v760_v8 }
 0x273   : > { %v1133_v32 = vpop.xlane.xlu1 %1132  ;;  %v1187_v56 = vadd.f32 %v1131_v43, %v835_v7  ;;  %v1123_v55 = vpop.xlane.xlu2 %1122  ;;  %v3297_v43 = vld [vmem:[#allocation25_spill] sm:$0xff]  ;;  %2120 = vpow2.f32 %v756_v3 }
 0x274   : > { %v1188_v63 = vadd.f32 %v1133_v32, %v836_v15  ;;  %v1183_v13 = vadd.f32 %v1123_v55, %v831_v48  ;;  %v3298_v48 = vld [vmem:[#allocation28_spill] sm:$0xff]  ;;  %v2115_v32 = vpop.eup %2114  ;;  %v3301_v55 = vld [vmem:[#allocation27_spill] sm:$0xff] }
 0x275   : > { %1220 = vst.msk [vmem:[#allocation3 + $0x38] sm:$0xff] %vm1212_vm2, %v1187_v56  ;;  %v3299_v59 = vsub.f32 %v3297_v43, %v3298_v48  ;;  %v3300_v56 = vld [vmem:[#allocation24_spill] sm:$0xff]  ;;  %v2117_v51 = vpop.eup %2116  ;;  %v837_v8 = vmul.f32 %v2115_v32, %v805_v11  ;;  %v808_v32 = vld [vmem:[#allocation3 + $0x60] sm:$0xff] }
 0x276   : > { %1221 = vst.msk [vmem:[#allocation3 + $0x40] sm:$0xff] %vm1212_vm2, %v1188_v63  ;;  %v3302_v4 = vsub.f32 %v3300_v56, %v3301_v55  ;;  %v841_v18 = vmul.f32 %v2117_v51, %v809_v60  ;;  %v3312_v51 = vld [vmem:[#allocation32_spill] sm:$0xff]  ;;  %v3313_v60 = vld [vmem:[#allocation35_spill] sm:$0xff] }
 0x277   : > { %1216 = vst.msk [vmem:[#allocation3 + $0x18] sm:$0xff] %vm1212_vm2, %v1183_v13  ;;  %v764_v52 = vmul.f32 1.442695, %v3299_v59  ;;  %v810_v13 = vld [vmem:[#allocation3 + $0x70] sm:$0xff] }
 0x278   : > { %v766_v44 = vmul.f32 1.442695, %v3302_v4  ;;  %v2119_v63 = vpop.eup %2118 }
 0x279   : > { %2122 = vpow2.f32 %v764_v52  ;;  %v842_v61 = vmul.f32 %v2119_v63, %v810_v13  ;;  %v812_v52 = vld [vmem:[#allocation3 + $0x80] sm:$0xff]  ;;  %v3314_v63 = vsub.f32 %v3312_v51, %v3313_v60 }
 0x27a   : > { %v1137_v37 = vpop.xlane.xlu0 %1136  ;;  %2124 = vpow2.f32 %v766_v44 }
 0x27b   : > { %v1139_v16 = vpop.xlane.xlu1 %1138  ;;  %v1190_v7 = vadd.f32 %v1137_v37, %v838_v24  ;;  %v1129_v15 = vpop.xlane.xlu2 %1128  ;;  %v3306_v37 = vld [vmem:[#allocation31_spill] sm:$0xff]  ;;  %2126 = vpow2.f32 %v762_v40  ;;  %v768_v13 = vmul.f32 1.442695, %v3314_v63 }
 0x27c   : > { %v1191_v0 = vadd.f32 %v1139_v16, %v839_v35  ;;  %v1186_v21 = vadd.f32 %v1129_v15, %v834_v47  ;;  %v3307_v47 = vld [vmem:[#allocation34_spill] sm:$0xff]  ;;  %v2121_v16 = vpop.eup %2120  ;;  %v3310_v15 = vld [vmem:[#allocation33_spill] sm:$0xff] }
 0x27d   : > { %1223 = vst.msk [vmem:[#allocation3 + $0x50] sm:$0xff] %vm1212_vm2, %v1190_v7  ;;  %v3308_v27 = vsub.f32 %v3306_v37, %v3307_v47  ;;  %v3309_v7 = vld [vmem:[#allocation30_spill] sm:$0xff]  ;;  %v840_v44 = vmul.f32 %v2121_v16, %v808_v32 }
 0x27e   : > { %1224 = vst.msk [vmem:[#allocation3 + $0x58] sm:$0xff] %vm1212_vm2, %v1191_v0  ;;  %v3311_v43 = vsub.f32 %v3309_v7, %v3310_v15  ;;  %v811_v16 = vld [vmem:[#allocation3 + $0x78] sm:$0xff] }
 0x27f   : > { %1219 = vst.msk [vmem:[#allocation3 + $0x30] sm:$0xff] %vm1212_vm2, %v1186_v21  ;;  %v770_v36 = vmul.f32 1.442695, %v3308_v27  ;;  %v2123_v59 = vpop.eup %2122  ;;  %v813_v21 = vld [vmem:[#allocation3 + $0x88] sm:$0xff] }
 0x280   : > { %v772_v48 = vmul.f32 1.442695, %v3311_v43  ;;  %v2125_v0 = vpop.eup %2124  ;;  %v844_v56 = vmul.f32 %v2123_v59, %v812_v52  ;;  %v3321_v59 = vld [vmem:[#allocation38_spill] sm:$0xff]  ;;  %v3322_v52 = vld [vmem:[#allocation41_spill] sm:$0xff] }
 0x281   : > { %2128 = vpow2.f32 %v770_v36  ;;  %v845_v55 = vmul.f32 %v2125_v0, %v813_v21  ;;  %v815_v36 = vld [vmem:[#allocation3 + $0x98] sm:$0xff]  ;;  %v3323_v0 = vsub.f32 %v3321_v59, %v3322_v52 }
 0x282   : > { %v1143_v31 = vpop.xlane.xlu0 %1142  ;;  %2130 = vpow2.f32 %v772_v48 }
 0x283   : > { %v1145_v39 = vpop.xlane.xlu1 %1144  ;;  %v1193_v24 = vadd.f32 %v1143_v31, %v841_v18  ;;  %v1135_v35 = vpop.xlane.xlu2 %1134  ;;  %v3315_v31 = vld [vmem:[#allocation37_spill] sm:$0xff]  ;;  %2132 = vpow2.f32 %v768_v13  ;;  %v774_v21 = vmul.f32 1.442695, %v3323_v0 }
 0x284   : > { %v1194_v12 = vadd.f32 %v1145_v39, %v842_v61  ;;  %v1189_v3 = vadd.f32 %v1135_v35, %v837_v8  ;;  %v3316_v8 = vld [vmem:[#allocation40_spill] sm:$0xff]  ;;  %v2127_v39 = vpop.eup %2126  ;;  %v3319_v35 = vld [vmem:[#allocation39_spill] sm:$0xff] }
 0x285   : > { %1226 = vst.msk [vmem:[#allocation3 + $0x68] sm:$0xff] %vm1212_vm2, %v1193_v24  ;;  %v3317_v20 = vsub.f32 %v3315_v31, %v3316_v8  ;;  %v3318_v24 = vld [vmem:[#allocation36_spill] sm:$0xff]  ;;  %v843_v48 = vmul.f32 %v2127_v39, %v811_v16  ;;  %v814_v39 = vld [vmem:[#allocation3 + $0x90] sm:$0xff] }
 0x286   : > { %1227 = vst.msk [vmem:[#allocation3 + $0x70] sm:$0xff] %vm1212_vm2, %v1194_v12  ;;  %v3320_v37 = vsub.f32 %v3318_v24, %v3319_v35 }
 0x287   : > { %1222 = vst.msk [vmem:[#allocation3 + $0x48] sm:$0xff] %vm1212_vm2, %v1189_v3  ;;  %v776_v23 = vmul.f32 1.442695, %v3317_v20  ;;  %v2129_v27 = vpop.eup %2128  ;;  %v816_v3 = vld [vmem:[#allocation3 + $0xa0] sm:$0xff] }
 0x288   : > { %v778_v47 = vmul.f32 1.442695, %v3320_v37  ;;  %v2131_v12 = vpop.eup %2130  ;;  %v847_v7 = vmul.f32 %v2129_v27, %v815_v36  ;;  %v3330_v27 = vld [vmem:[#allocation44_spill] sm:$0xff]  ;;  %v3331_v36 = vld [vmem:[#allocation47_spill] sm:$0xff] }
 0x289   : > { %2134 = vpow2.f32 %v776_v23  ;;  %v848_v15 = vmul.f32 %v2131_v12, %v816_v3  ;;  %v818_v23 = vld [vmem:[#allocation3 + $0xb0] sm:$0xff]  ;;  %v3332_v12 = vsub.f32 %v3330_v27, %v3331_v36  ;;  %v3342_v36 = vld [vmem:[#allocation50_spill] sm:$0xff] }
 0x28a   : > { %v1149_v4 = vpop.xlane.xlu0 %1148  ;;  %2136 = vpow2.f32 %v778_v47 }
 0x28b   : > { %v1151_v11 = vpop.xlane.xlu1 %1150  ;;  %v1196_v18 = vadd.f32 %v1149_v4, %v844_v56  ;;  %v1141_v61 = vpop.xlane.xlu2 %1140  ;;  %v3324_v4 = vld [vmem:[#allocation43_spill] sm:$0xff]  ;;  %2138 = vpow2.f32 %v774_v21  ;;  %v780_v3 = vmul.f32 1.442695, %v3332_v12  ;;  %v3343_v12 = vld [vmem:[#allocation53_spill] sm:$0xff] }
 0x28c   : > { %v1197_v28 = vadd.f32 %v1151_v11, %v845_v55  ;;  %v1192_v40 = vadd.f32 %v1141_v61, %v840_v44  ;;  %v3325_v44 = vld [vmem:[#allocation46_spill] sm:$0xff]  ;;  %v2133_v11 = vpop.eup %2132  ;;  %v3328_v61 = vld [vmem:[#allocation45_spill] sm:$0xff] }
 0x28d   : > { %1229 = vst.msk [vmem:[#allocation3 + $0x80] sm:$0xff] %vm1212_vm2, %v1196_v18  ;;  %v3326_v51 = vsub.f32 %v3324_v4, %v3325_v44  ;;  %v3327_v18 = vld [vmem:[#allocation42_spill] sm:$0xff]  ;;  %v846_v47 = vmul.f32 %v2133_v11, %v814_v39  ;;  %v817_v11 = vld [vmem:[#allocation3 + $0xa8] sm:$0xff] }
 0x28e   : > { %1230 = vst.msk [vmem:[#allocation3 + $0x88] sm:$0xff] %vm1212_vm2, %v1197_v28  ;;  %v3329_v31 = vsub.f32 %v3327_v18, %v3328_v61  ;;  %v3340_v39 = vld [vmem:[#allocation56_spill] sm:$0xff] }
 0x28f   : > { %1225 = vst.msk [vmem:[#allocation3 + $0x60] sm:$0xff] %vm1212_vm2, %v1192_v40  ;;  %v782_v60 = vmul.f32 1.442695, %v3326_v51  ;;  %v2135_v20 = vpop.eup %2134  ;;  %v819_v40 = vld [vmem:[#allocation3 + $0xb8] sm:$0xff] }
 0x290   : > { %v784_v8 = vmul.f32 1.442695, %v3329_v31  ;;  %v2137_v28 = vpop.eup %2136  ;;  %v850_v24 = vmul.f32 %v2135_v20, %v818_v23 }
 0x291   : > { %2140 = vpow2.f32 %v782_v60  ;;  %v851_v35 = vmul.f32 %v2137_v28, %v819_v40  ;;  %v821_v60 = vld [vmem:[#allocation3 + $0xc8] sm:$0xff]  ;;  %v3339_v40 = vld [vmem:[#allocation54_spill] sm:$0xff] }
 0x292   : > { %v1155_v43 = vpop.xlane.xlu0 %1154  ;;  %2142 = vpow2.f32 %v784_v8 }
 0x293   : > { %v1157_v32 = vpop.xlane.xlu1 %1156  ;;  %v1199_v56 = vadd.f32 %v1155_v43, %v847_v7  ;;  %v1147_v55 = vpop.xlane.xlu2 %1146  ;;  %v3333_v43 = vld [vmem:[#allocation49_spill] sm:$0xff]  ;;  %2144 = vpow2.f32 %v780_v3  ;;  %v3344_v3 = vsub.f32 %v3342_v36, %v3343_v12 }
 0x294   : > { %v1200_v63 = vadd.f32 %v1157_v32, %v848_v15  ;;  %v1195_v13 = vadd.f32 %v1147_v55, %v843_v48  ;;  %v3334_v48 = vld [vmem:[#allocation52_spill] sm:$0xff]  ;;  %v2139_v32 = vpop.eup %2138  ;;  %v3337_v55 = vld [vmem:[#allocation51_spill] sm:$0xff] }
 0x295   : > { %1232 = vst.msk [vmem:[#allocation3 + $0x98] sm:$0xff] %vm1212_vm2, %v1199_v56  ;;  %v3335_v59 = vsub.f32 %v3333_v43, %v3334_v48  ;;  %v3336_v56 = vld [vmem:[#allocation48_spill] sm:$0xff]  ;;  %v849_v8 = vmul.f32 %v2139_v32, %v817_v11 }
 0x296   : > { %1233 = vst.msk [vmem:[#allocation3 + $0xa0] sm:$0xff] %vm1212_vm2, %v1200_v63  ;;  %v3338_v4 = vsub.f32 %v3336_v56, %v3337_v55  ;;  %v825_v48 = vld [vmem:[#allocation3 + $0xe8] sm:$0xff] }
 0x297   : > { %1228 = vst.msk [vmem:[#allocation3 + $0x78] sm:$0xff] %vm1212_vm2, %v1195_v13  ;;  %v788_v52 = vmul.f32 1.442695, %v3335_v59  ;;  %v2141_v51 = vpop.eup %2140  ;;  %v822_v13 = vld [vmem:[#allocation3 + $0xd0] sm:$0xff]  ;;  %v820_v59 = vld [vmem:[#allocation3 + $0xc0] sm:$0xff] }
 0x298   : > { %v790_v44 = vmul.f32 1.442695, %v3338_v4  ;;  %v2143_v63 = vpop.eup %2142  ;;  %v853_v18 = vmul.f32 %v2141_v51, %v821_v60  ;;  %v3345_v60 = vld [vmem:[#allocation55_spill] sm:$0xff] }
 0x299   : > { %2146 = vpow2.f32 %v788_v52  ;;  %v854_v61 = vmul.f32 %v2143_v63, %v822_v13  ;;  %v2145_v27 = vpop.eup %2144  ;;  %v3346_v63 = vld [vmem:[#allocation57_spill] sm:$0xff] }
 0x29a   : > { %v1161_v37 = vpop.xlane.xlu0 %1160  ;;  %2148 = vpow2.f32 %v790_v44  ;;  %v852_v32 = vmul.f32 %v2145_v27, %v820_v59  ;;  %v3347_v13 = vsub.f32 %v3345_v60, %v3346_v63 }
 0x29b   : > { %v1163_v16 = vpop.xlane.xlu1 %1162  ;;  %v1202_v7 = vadd.f32 %v1161_v37, %v850_v24  ;;  %v1153_v15 = vpop.xlane.xlu2 %1152  ;;  %v3341_v24 = vsub.f32 %v3339_v40, %v3340_v39 }
 0x29c   : > { %v1203_v0 = vadd.f32 %v1163_v16, %v851_v35  ;;  %v1198_v21 = vadd.f32 %v1153_v15, %v846_v47  ;;  %v786_v16 = vmul.f32 1.442695, %v3344_v3  ;;  %v824_v15 = vld [vmem:[#allocation3 + $0xe0] sm:$0xff]  ;;  %v792_v11 = vmul.f32 1.442695, %v3347_v13 }
 0x29d   : > { %1235 = vst.msk [vmem:[#allocation3 + $0xb0] sm:$0xff] %vm1212_vm2, %v1202_v7  ;;  %v794_v35 = vmul.f32 1.442695, %v3341_v24 }
 0x29e   : > { %1236 = vst.msk [vmem:[#allocation3 + $0xb8] sm:$0xff] %vm1212_vm2, %v1203_v0 }
 0x29f   : > { %1231 = vst.msk [vmem:[#allocation3 + $0x90] sm:$0xff] %vm1212_vm2, %v1198_v21  ;;  %v2147_v7 = vpop.eup %2146  ;;  %2150 = vpow2.f32 %v794_v35 }
 0x2a0   : > { %v2149_v43 = vpop.eup %2148  ;;  %2152 = vpow2.f32 %v786_v16  ;;  %v856_v52 = vmul.f32 %v2147_v7, %v824_v15 }
 0x2a1   : > { %v857_v0 = vmul.f32 %v2149_v43, %v825_v48  ;;  %2154 = vpow2.f32 %v792_v11 }
 0x2a2   : > { %v1167_v31 = vpop.xlane.xlu0 %1166 }
 0x2a3   : > { %v1169_v20 = vpop.xlane.xlu1 %1168  ;;  %v1205_v23 = vadd.f32 %v1167_v31, %v853_v18  ;;  %v1159_v28 = vpop.xlane.xlu2 %1158 }
 0x2a4   : > { %v1206_v37 = vadd.f32 %v1169_v20, %v854_v61  ;;  %v1201_v47 = vadd.f32 %v1159_v28, %v849_v8  ;;  %v827_v61 = vld [vmem:[#allocation3 + $0xf8] sm:$0xff] }
 0x2a5   : > { %1238 = vst.msk [vmem:[#allocation3 + $0xc8] sm:$0xff] %vm1212_vm2, %v1205_v23  ;;  %v2151_v18 = vpop.eup %2150  ;;  %v823_v8 = vld [vmem:[#allocation3 + $0xd8] sm:$0xff] }
 0x2a6   : > { %1239 = vst.msk [vmem:[#allocation3 + $0xd0] sm:$0xff] %vm1212_vm2, %v1206_v37  ;;  %v2153_v31 = vpop.eup %2152  ;;  %v859_v20 = vmul.f32 %v2151_v18, %v827_v61  ;;  %v826_v37 = vld [vmem:[#allocation3 + $0xf0] sm:$0xff] }
 0x2a7   : > { %1234 = vst.msk [vmem:[#allocation3 + $0xa8] sm:$0xff] %vm1212_vm2, %v1201_v47  ;;  %v855_v28 = vmul.f32 %v2153_v31, %v823_v8  ;;  %v2155_v35 = vpop.eup %2154 }
 0x2a8   : > { %v858_v47 = vmul.f32 %v2155_v35, %v826_v37 }
 0x2aa   : > { %v1173_v21 = vpop.xlane.xlu0 %1172 }
 0x2ab   : > { %v1175_v56 = vpop.xlane.xlu1 %1174  ;;  %v1208_v55 = vadd.f32 %v1173_v21, %v856_v52  ;;  %v1165_v4 = vpop.xlane.xlu2 %1164 }
 0x2ac   : > { %v1209_v44 = vadd.f32 %v1175_v56, %v857_v0  ;;  %v1204_v51 = vadd.f32 %v1165_v4, %v852_v32 }
 0x2ad   : > { %1241 = vst.msk [vmem:[#allocation3 + $0xe0] sm:$0xff] %vm1212_vm2, %v1208_v55 }
 0x2ae   : > { %1242 = vst.msk [vmem:[#allocation3 + $0xe8] sm:$0xff] %vm1212_vm2, %v1209_v44 }
 0x2af   : > { %1237 = vst.msk [vmem:[#allocation3 + $0xc0] sm:$0xff] %vm1212_vm2, %v1204_v51 }
 0x2b2   : > { %v1179_v23 = vpop.xlane.xlu0 %1178 }
 0x2b3   : > { %v1211_v40 = vadd.f32 %v1179_v23, %v859_v20  ;;  %v1171_v39 = vpop.xlane.xlu2 %1170 }
 0x2b4   : > { %v1207_v24 = vadd.f32 %v1171_v39, %v855_v28 }
 0x2b5   : > { %1244 = vst.msk [vmem:[#allocation3 + $0xf8] sm:$0xff] %vm1212_vm2, %v1211_v40 }
 0x2b6   : > { %1240 = vst.msk [vmem:[#allocation3 + $0xd8] sm:$0xff] %vm1212_vm2, %v1207_v24 }
 0x2bb   : > { %v1177_v27 = vpop.xlane.xlu2 %1176 }
 0x2bc   : > { %v1210_v36 = vadd.f32 %v1177_v27, %v858_v47 }
 0x2be   : > { %1243 = vst.msk [vmem:[#allocation3 + $0xf0] sm:$0xff] %vm1212_vm2, %v1210_v36 }
 0x2bf PF: > { %1278 = sbr.rel (!%p498_p4) target bundleno = 747 (0x2eb), region = 44  ;;  %v1311_v12 = vld [vmem:[#allocation3] sm:$0xff] (%p498_p4)  ;;  %v1312_v3 = vld [vmem:[#allocation3 + $0x8] sm:$0xff] (%p498_p4)  ;;  %v1313_v16 = vld [vmem:[#allocation3 + $0x10] sm:$0xff] (%p498_p4)  ;;  %vm1439_vm3 = vcmask (%p498_p4), 7168  }
 0x2c0   : > { %2156 = vlog2.f32 (%p498_p4), %v1311_v12  ;;  %v1314_v7 = vld [vmem:[#allocation3 + $0x18] sm:$0xff] (%p498_p4)  ;;  %v1315_v15 = vld [vmem:[#allocation3 + $0x20] sm:$0xff] (%p498_p4)  ;;  %v1316_v43 = vld [vmem:[#allocation3 + $0x28] sm:$0xff] (%p498_p4) }
 0x2c1   : > { %2158 = vlog2.f32 (%p498_p4), %v1312_v3  ;;  %v1317_v48 = vld [vmem:[#allocation3 + $0x30] sm:$0xff] (%p498_p4)  ;;  %v1318_v59 = vld [vmem:[#allocation3 + $0x38] sm:$0xff] (%p498_p4)  ;;  %v1319_v52 = vld [vmem:[#allocation3 + $0x40] sm:$0xff] (%p498_p4) }
 0x2c2   : > { %2160 = vlog2.f32 (%p498_p4), %v1313_v16  ;;  %v1279_v21 = vld [vmem:[#allocation2] sm:$0xff] (%p498_p4)  ;;  %v1320_v32 = vld [vmem:[#allocation3 + $0x48] sm:$0xff] (%p498_p4)  ;;  %v1321_v44 = vld [vmem:[#allocation3 + $0x50] sm:$0xff] (%p498_p4) }
 0x2c3   : > { %2162 = vlog2.f32 (%p498_p4), %v1314_v7  ;;  %v1280_v4 = vld [vmem:[#allocation2 + $0x8] sm:$0xff] (%p498_p4)  ;;  %v1281_v63 = vld [vmem:[#allocation2 + $0x10] sm:$0xff] (%p498_p4)  ;;  %v1322_v13 = vld [vmem:[#allocation3 + $0x58] sm:$0xff] (%p498_p4) }
 0x2c4   : > { %2164 = vlog2.f32 %v1315_v15  ;;  %v1282_v31 = vld [vmem:[#allocation2 + $0x18] sm:$0xff]  ;;  %v1323_v8 = vld [vmem:[#allocation3 + $0x60] sm:$0xff]  ;;  %v1324_v39 = vld [vmem:[#allocation3 + $0x68] sm:$0xff] }
 0x2c5   : > { %2166 = vlog2.f32 %v1316_v43  ;;  %v1283_v40 = vld [vmem:[#allocation2 + $0x20] sm:$0xff]  ;;  %v1284_v47 = vld [vmem:[#allocation2 + $0x28] sm:$0xff]  ;;  %v1325_v27 = vld [vmem:[#allocation3 + $0x70] sm:$0xff] }
 0x2c6   : > { %v2157_v0 = vpop.eup %2156  ;;  %2168 = vlog2.f32 %v1317_v48  ;;  %v1285_v16 = vld [vmem:[#allocation2 + $0x30] sm:$0xff]  ;;  %v1326_v7 = vld [vmem:[#allocation3 + $0x78] sm:$0xff] }
 0x2c7   : > { %v2159_v56 = vpop.eup %2158  ;;  %v1344_v55 = vmul.f32 0.6931472, %v2157_v0  ;;  %2170 = vlog2.f32 %v1318_v59  ;;  %v1286_v59 = vld [vmem:[#allocation2 + $0x38] sm:$0xff] }
 0x2c8   : > { %v2161_v51 = vpop.eup %2160  ;;  %v1346_v60 = vmul.f32 0.6931472, %v2159_v56  ;;  %2172 = vlog2.f32 %v1319_v52  ;;  %v1327_v52 = vld [vmem:[#allocation3 + $0x80] sm:$0xff] }
 0x2c9   : > { %v2163_v11 = vpop.eup %2162  ;;  %v1407_v18 = vadd.f32 %v1344_v55, %v1279_v21  ;;  %v1348_v61 = vmul.f32 0.6931472, %v2161_v51  ;;  %2174 = vlog2.f32 %v1320_v32  ;;  %v1287_v56 = vld [vmem:[#allocation2 + $0x40] sm:$0xff]  ;;  %v1328_v55 = vld [vmem:[#allocation3 + $0x88] sm:$0xff] }
 0x2ca   : > { %v2165_v20 = vpop.eup %2164  ;;  %v1408_v23 = vadd.f32 %v1346_v60, %v1280_v4  ;;  %v1350_v28 = vmul.f32 0.6931472, %v2163_v11  ;;  %2176 = vlog2.f32 %v1321_v44  ;;  %v1288_v60 = vld [vmem:[#allocation2 + $0x48] sm:$0xff] }
 0x2cb   : > { %v2167_v24 = vpop.eup %2166  ;;  %1440 = vst.msk [vmem:[#allocation2] sm:$0xff] %vm1439_vm3, %v1407_v18  ;;  %v1409_v35 = vadd.f32 %v1348_v61, %v1281_v63  ;;  %v1352_v37 = vmul.f32 0.6931472, %v2165_v20  ;;  %2178 = vlog2.f32 %v1322_v13  ;;  %v1329_v63 = vld [vmem:[#allocation3 + $0x90] sm:$0xff] }
 0x2cc   : > { %v2169_v36 = vpop.eup %2168  ;;  %1441 = vst.msk [vmem:[#allocation2 + $0x8] sm:$0xff] %vm1439_vm3, %v1408_v23  ;;  %v1410_v12 = vadd.f32 %v1350_v28, %v1282_v31  ;;  %v1354_v3 = vmul.f32 0.6931472, %v2167_v24  ;;  %2180 = vlog2.f32 %v1323_v8  ;;  %v1289_v61 = vld [vmem:[#allocation2 + $0x50] sm:$0xff]  ;;  %v1330_v31 = vld [vmem:[#allocation3 + $0x98] sm:$0xff] }
 0x2cd   : > { %v2171_v15 = vpop.eup %2170  ;;  %1442 = vst.msk [vmem:[#allocation2 + $0x10] sm:$0xff] %vm1439_vm3, %v1409_v35  ;;  %v1411_v43 = vadd.f32 %v1352_v37, %v1283_v40  ;;  %v1356_v48 = vmul.f32 0.6931472, %v2169_v36  ;;  %2182 = vlog2.f32 %v1324_v39  ;;  %v1290_v28 = vld [vmem:[#allocation2 + $0x58] sm:$0xff]  ;;  %v1331_v40 = vld [vmem:[#allocation3 + $0xa0] sm:$0xff] }
 0x2ce   : > { %v2173_v0 = vpop.eup %2172  ;;  %1443 = vst.msk [vmem:[#allocation2 + $0x18] sm:$0xff] %vm1439_vm3, %v1410_v12  ;;  %v1412_v21 = vadd.f32 %v1354_v3, %v1284_v47  ;;  %v1358_v32 = vmul.f32 0.6931472, %v2171_v15  ;;  %2184 = vlog2.f32 %v1325_v27  ;;  %v1291_v37 = vld [vmem:[#allocation2 + $0x60] sm:$0xff]  ;;  %v1332_v47 = vld [vmem:[#allocation3 + $0xa8] sm:$0xff] }
 0x2cf   : > { %v2175_v4 = vpop.eup %2174  ;;  %1444 = vst.msk [vmem:[#allocation2 + $0x20] sm:$0xff] %vm1439_vm3, %v1411_v43  ;;  %v1413_v44 = vadd.f32 %v1356_v48, %v1285_v16  ;;  %v1360_v51 = vmul.f32 0.6931472, %v2173_v0  ;;  %2186 = vlog2.f32 %v1326_v7  ;;  %v1292_v3 = vld [vmem:[#allocation2 + $0x68] sm:$0xff]  ;;  %v1333_v16 = vld [vmem:[#allocation3 + $0xb0] sm:$0xff] }
 0x2d0   : > { %v2177_v13 = vpop.eup %2176  ;;  %1445 = vst.msk [vmem:[#allocation2 + $0x28] sm:$0xff] %vm1439_vm3, %v1412_v21  ;;  %v1414_v11 = vadd.f32 %v1358_v32, %v1286_v59  ;;  %v1362_v18 = vmul.f32 0.6931472, %v2175_v4  ;;  %2188 = vlog2.f32 %v1327_v52  ;;  %v1293_v48 = vld [vmem:[#allocation2 + $0x70] sm:$0xff]  ;;  %v1334_v59 = vld [vmem:[#allocation3 + $0xb8] sm:$0xff] }
 0x2d1   : > { %v2179_v8 = vpop.eup %2178  ;;  %1446 = vst.msk [vmem:[#allocation2 + $0x30] sm:$0xff] %vm1439_vm3, %v1413_v44  ;;  %v1415_v20 = vadd.f32 %v1360_v51, %v1287_v56  ;;  %v1364_v23 = vmul.f32 0.6931472, %v2177_v13  ;;  %2190 = vlog2.f32 %v1328_v55  ;;  %v1294_v32 = vld [vmem:[#allocation2 + $0x78] sm:$0xff]  ;;  %v1335_v56 = vld [vmem:[#allocation3 + $0xc0] sm:$0xff] }
 0x2d2   : > { %v2181_v39 = vpop.eup %2180  ;;  %1447 = vst.msk [vmem:[#allocation2 + $0x38] sm:$0xff] %vm1439_vm3, %v1414_v11  ;;  %v1416_v24 = vadd.f32 %v1362_v18, %v1288_v60  ;;  %v1366_v35 = vmul.f32 0.6931472, %v2179_v8  ;;  %2192 = vlog2.f32 %v1329_v63  ;;  %v1295_v51 = vld [vmem:[#allocation2 + $0x80] sm:$0xff]  ;;  %v1336_v60 = vld [vmem:[#allocation3 + $0xc8] sm:$0xff] }
 0x2d3   : > { %v2183_v27 = vpop.eup %2182  ;;  %1448 = vst.msk [vmem:[#allocation2 + $0x40] sm:$0xff] %vm1439_vm3, %v1415_v20  ;;  %v1417_v36 = vadd.f32 %v1364_v23, %v1289_v61  ;;  %v1368_v12 = vmul.f32 0.6931472, %v2181_v39  ;;  %2194 = vlog2.f32 %v1330_v31  ;;  %v1296_v18 = vld [vmem:[#allocation2 + $0x88] sm:$0xff]  ;;  %v1337_v61 = vld [vmem:[#allocation3 + $0xd0] sm:$0xff] }
 0x2d4   : > { %v2185_v7 = vpop.eup %2184  ;;  %1449 = vst.msk [vmem:[#allocation2 + $0x48] sm:$0xff] %vm1439_vm3, %v1416_v24  ;;  %v1418_v15 = vadd.f32 %v1366_v35, %v1290_v28  ;;  %v1370_v43 = vmul.f32 0.6931472, %v2183_v27  ;;  %2196 = vlog2.f32 %v1331_v40  ;;  %v1297_v23 = vld [vmem:[#allocation2 + $0x90] sm:$0xff]  ;;  %v1338_v28 = vld [vmem:[#allocation3 + $0xd8] sm:$0xff] }
 0x2d5   : > { %v2187_v52 = vpop.eup %2186  ;;  %1450 = vst.msk [vmem:[#allocation2 + $0x50] sm:$0xff] %vm1439_vm3, %v1417_v36  ;;  %v1419_v0 = vadd.f32 %v1368_v12, %v1291_v37  ;;  %v1372_v21 = vmul.f32 0.6931472, %v2185_v7  ;;  %2198 = vlog2.f32 %v1332_v47  ;;  %v1298_v35 = vld [vmem:[#allocation2 + $0x98] sm:$0xff]  ;;  %v1339_v37 = vld [vmem:[#allocation3 + $0xe0] sm:$0xff] }
 0x2d6   : > { %v2189_v55 = vpop.eup %2188  ;;  %1451 = vst.msk [vmem:[#allocation2 + $0x58] sm:$0xff] %vm1439_vm3, %v1418_v15  ;;  %v1420_v4 = vadd.f32 %v1370_v43, %v1292_v3  ;;  %v1374_v44 = vmul.f32 0.6931472, %v2187_v52  ;;  %2200 = vlog2.f32 %v1333_v16  ;;  %v1299_v12 = vld [vmem:[#allocation2 + $0xa0] sm:$0xff]  ;;  %v1340_v3 = vld [vmem:[#allocation3 + $0xe8] sm:$0xff] }
 0x2d7   : > { %v2191_v63 = vpop.eup %2190  ;;  %1452 = vst.msk [vmem:[#allocation2 + $0x60] sm:$0xff] %vm1439_vm3, %v1419_v0  ;;  %v1421_v13 = vadd.f32 %v1372_v21, %v1293_v48  ;;  %v1376_v11 = vmul.f32 0.6931472, %v2189_v55  ;;  %2202 = vlog2.f32 %v1334_v59  ;;  %v1300_v43 = vld [vmem:[#allocation2 + $0xa8] sm:$0xff]  ;;  %v1341_v48 = vld [vmem:[#allocation3 + $0xf0] sm:$0xff] }
 0x2d8   : > { %v2193_v31 = vpop.eup %2192  ;;  %1453 = vst.msk [vmem:[#allocation2 + $0x68] sm:$0xff] %vm1439_vm3, %v1420_v4  ;;  %v1422_v8 = vadd.f32 %v1374_v44, %v1294_v32  ;;  %v1378_v20 = vmul.f32 0.6931472, %v2191_v63  ;;  %2204 = vlog2.f32 %v1335_v56  ;;  %v1301_v21 = vld [vmem:[#allocation2 + $0xb0] sm:$0xff]  ;;  %v1342_v32 = vld [vmem:[#allocation3 + $0xf8] sm:$0xff] }
 0x2d9   : > { %v2195_v40 = vpop.eup %2194  ;;  %1454 = vst.msk [vmem:[#allocation2 + $0x70] sm:$0xff] %vm1439_vm3, %v1421_v13  ;;  %v1423_v39 = vadd.f32 %v1376_v11, %v1295_v51  ;;  %v1380_v24 = vmul.f32 0.6931472, %v2193_v31  ;;  %2206 = vlog2.f32 %v1336_v60  ;;  %v1302_v44 = vld [vmem:[#allocation2 + $0xb8] sm:$0xff]  ;;  %v1303_v13 = vld [vmem:[#allocation2 + $0xc0] sm:$0xff]  ;;  %v1304_v31 = vld [vmem:[#allocation2 + $0xc8] sm:$0xff] }
 0x2da   : > { %v2197_v47 = vpop.eup %2196  ;;  %1455 = vst.msk [vmem:[#allocation2 + $0x78] sm:$0xff] %vm1439_vm3, %v1422_v8  ;;  %v1424_v27 = vadd.f32 %v1378_v20, %v1296_v18  ;;  %v1382_v36 = vmul.f32 0.6931472, %v2195_v40  ;;  %2208 = vlog2.f32 %v1337_v61 }
 0x2db   : > { %v2199_v16 = vpop.eup %2198  ;;  %1456 = vst.msk [vmem:[#allocation2 + $0x80] sm:$0xff] %vm1439_vm3, %v1423_v39  ;;  %v1425_v7 = vadd.f32 %v1380_v24, %v1297_v23  ;;  %v1384_v15 = vmul.f32 0.6931472, %v2197_v47  ;;  %2210 = vlog2.f32 %v1338_v28  ;;  %v1305_v28 = vld [vmem:[#allocation2 + $0xd0] sm:$0xff] }
 0x2dc   : > { %v2201_v59 = vpop.eup %2200  ;;  %1457 = vst.msk [vmem:[#allocation2 + $0x88] sm:$0xff] %vm1439_vm3, %v1424_v27  ;;  %v1426_v52 = vadd.f32 %v1382_v36, %v1298_v35  ;;  %v1386_v0 = vmul.f32 0.6931472, %v2199_v16  ;;  %2212 = vlog2.f32 %v1339_v37  ;;  %v1306_v35 = vld [vmem:[#allocation2 + $0xd8] sm:$0xff]  ;;  %v1307_v36 = vld [vmem:[#allocation2 + $0xe0] sm:$0xff] }
 0x2dd   : > { %v2203_v56 = vpop.eup %2202  ;;  %1458 = vst.msk [vmem:[#allocation2 + $0x90] sm:$0xff] %vm1439_vm3, %v1425_v7  ;;  %v1427_v55 = vadd.f32 %v1384_v15, %v1299_v12  ;;  %v1388_v4 = vmul.f32 0.6931472, %v2201_v59  ;;  %2214 = vlog2.f32 %v1340_v3  ;;  %v1308_v7 = vld [vmem:[#allocation2 + $0xe8] sm:$0xff]  ;;  %v1309_v59 = vld [vmem:[#allocation2 + $0xf0] sm:$0xff] }
 0x2de   : > { %v2205_v51 = vpop.eup %2204  ;;  %1459 = vst.msk [vmem:[#allocation2 + $0x98] sm:$0xff] %vm1439_vm3, %v1426_v52  ;;  %v1428_v60 = vadd.f32 %v1386_v0, %v1300_v43  ;;  %v1390_v63 = vmul.f32 0.6931472, %v2203_v56  ;;  %2216 = vlog2.f32 %v1341_v48 }
 0x2df   : > { %v2207_v11 = vpop.eup %2206  ;;  %1460 = vst.msk [vmem:[#allocation2 + $0xa0] sm:$0xff] %vm1439_vm3, %v1427_v55  ;;  %v1429_v18 = vadd.f32 %v1388_v4, %v1301_v21  ;;  %v1392_v61 = vmul.f32 0.6931472, %v2205_v51  ;;  %2218 = vlog2.f32 %v1342_v32  ;;  %v1310_v32 = vld [vmem:[#allocation2 + $0xf8] sm:$0xff] }
 0x2e0   : > { %v2209_v8 = vpop.eup %2208  ;;  %1461 = vst.msk [vmem:[#allocation2 + $0xa8] sm:$0xff] %vm1439_vm3, %v1428_v60  ;;  %v1430_v20 = vadd.f32 %v1390_v63, %v1302_v44  ;;  %v1394_v23 = vmul.f32 0.6931472, %v2207_v11 }
 0x2e1   : > { %v2211_v40 = vpop.eup %2210  ;;  %1462 = vst.msk [vmem:[#allocation2 + $0xb0] sm:$0xff] %vm1439_vm3, %v1429_v18  ;;  %v1431_v39 = vadd.f32 %v1392_v61, %v1303_v13  ;;  %v1396_v24 = vmul.f32 0.6931472, %v2209_v8 }
 0x2e2   : > { %v2213_v37 = vpop.eup %2212  ;;  %1463 = vst.msk [vmem:[#allocation2 + $0xb8] sm:$0xff] %vm1439_vm3, %v1430_v20  ;;  %v1432_v47 = vadd.f32 %v1394_v23, %v1304_v31  ;;  %v1398_v27 = vmul.f32 0.6931472, %v2211_v40 }
 0x2e3   : > { %v2215_v12 = vpop.eup %2214  ;;  %1464 = vst.msk [vmem:[#allocation2 + $0xc0] sm:$0xff] %vm1439_vm3, %v1431_v39  ;;  %v1433_v3 = vadd.f32 %v1396_v24, %v1305_v28  ;;  %v1400_v16 = vmul.f32 0.6931472, %v2213_v37 }
 0x2e4   : > { %v2217_v15 = vpop.eup %2216  ;;  %1465 = vst.msk [vmem:[#allocation2 + $0xc8] sm:$0xff] %vm1439_vm3, %v1432_v47  ;;  %v1434_v43 = vadd.f32 %v1398_v27, %v1306_v35  ;;  %v1402_v48 = vmul.f32 0.6931472, %v2215_v12 }
 0x2e5   : > { %v2219_v52 = vpop.eup %2218  ;;  %1466 = vst.msk [vmem:[#allocation2 + $0xd0] sm:$0xff] %vm1439_vm3, %v1433_v3  ;;  %v1435_v0 = vadd.f32 %v1400_v16, %v1307_v36  ;;  %v1404_v21 = vmul.f32 0.6931472, %v2217_v15 }
 0x2e6   : > { %1467 = vst.msk [vmem:[#allocation2 + $0xd8] sm:$0xff] %vm1439_vm3, %v1434_v43  ;;  %v1436_v56 = vadd.f32 %v1402_v48, %v1308_v7  ;;  %v1406_v55 = vmul.f32 0.6931472, %v2219_v52 }
 0x2e7   : > { %1468 = vst.msk [vmem:[#allocation2 + $0xe0] sm:$0xff] %vm1439_vm3, %v1435_v0  ;;  %v1437_v4 = vadd.f32 %v1404_v21, %v1309_v59 }
 0x2e8   : > { %1469 = vst.msk [vmem:[#allocation2 + $0xe8] sm:$0xff] %vm1439_vm3, %v1436_v56  ;;  %v1438_v44 = vadd.f32 %v1406_v55, %v1310_v32 }
 0x2e9   : > { %1470 = vst.msk [vmem:[#allocation2 + $0xf0] sm:$0xff] %vm1439_vm3, %v1437_v4 }
 0x2ea   : > { %1471 = vst.msk [vmem:[#allocation2 + $0xf8] sm:$0xff] %vm1439_vm3, %v1438_v44 }
 0x2eb PF: > { %p1952_p6 = scmp.ne.s32.totalorder %s2269_s12, 1 }
 0x2ed   : > { %1475 = sbr.rel (%p1952_p6) target bundleno = 956 (0x3bc), region = 48 }
 0x2f2   : > { %v1480_v51 = vld [vmem:[#allocation2 + $0x20] sm:$0xff]  ;;  %v1478_v60 = vld [vmem:[#allocation2 + $0x10] sm:$0xff]  ;;  %v2282_v13 = vmov 0   ;;  %v1481_v11 = vld [vmem:[#allocation2 + $0x28] sm:$0xff] }
 0x2f3   : > { %v1476_v63 = vld [vmem:[#allocation2] sm:$0xff]  ;;  %2222 = vset.pattern.permute.xlu2 %v2282_v13  ;;  %2221 = vset.pattern.permute.xlu1 %v2282_v13  ;;  %v1479_v18 = vld [vmem:[#allocation2 + $0x18] sm:$0xff]  ;;  %v1477_v61 = vld [vmem:[#allocation2 + $0x8] sm:$0xff] }
 0x2f4   : > { %2220 = vset.pattern.permute.xlu0 %v2282_v13  ;;  %1530 = vperm.xlu2 %2222, %v1480_v51   ;;  %v1484_v31 = vld [vmem:[#allocation2 + $0x40] sm:$0xff]  ;;  %v1483_v8 = vld [vmem:[#allocation2 + $0x38] sm:$0xff]  ;;  %v1482_v20 = vld [vmem:[#allocation2 + $0x30] sm:$0xff] }
 0x2f5   : > { %1520 = vperm.xlu1 %2221, %v1478_v60   ;;  %1510 = vperm.xlu0 %2220, %v1476_v63   ;;  %v1487_v23 = vld [vmem:[#allocation2 + $0x58] sm:$0xff]  ;;  %v1486_v28 = vld [vmem:[#allocation2 + $0x50] sm:$0xff]  ;;  %v1485_v40 = vld [vmem:[#allocation2 + $0x48] sm:$0xff] }
 0x2f6   : > { %v1490_v39 = vld [vmem:[#allocation2 + $0x70] sm:$0xff]  ;;  %v1489_v24 = vld [vmem:[#allocation2 + $0x68] sm:$0xff]  ;;  %v1488_v35 = vld [vmem:[#allocation2 + $0x60] sm:$0xff] }
 0x2f7   : > { %v1493_v37 = vld [vmem:[#allocation2 + $0x88] sm:$0xff]  ;;  %v1492_v47 = vld [vmem:[#allocation2 + $0x80] sm:$0xff]  ;;  %v1491_v27 = vld [vmem:[#allocation2 + $0x78] sm:$0xff] }
 0x2f8   : > { %v1496_v36 = vld [vmem:[#allocation2 + $0xa0] sm:$0xff]  ;;  %v1495_v12 = vld [vmem:[#allocation2 + $0x98] sm:$0xff]  ;;  %v1494_v3 = vld [vmem:[#allocation2 + $0x90] sm:$0xff] }
 0x2f9   : > { %v1499_v16 = vld [vmem:[#allocation2 + $0xb8] sm:$0xff]  ;;  %v1498_v7 = vld [vmem:[#allocation2 + $0xb0] sm:$0xff]  ;;  %v1497_v15 = vld [vmem:[#allocation2 + $0xa8] sm:$0xff] }
 0x2fa   : > { %v1502_v43 = vld [vmem:[#allocation2 + $0xd0] sm:$0xff]  ;;  %v1501_v48 = vld [vmem:[#allocation2 + $0xc8] sm:$0xff]  ;;  %v1500_v59 = vld [vmem:[#allocation2 + $0xc0] sm:$0xff] }
 0x2fb   : > { %v1505_v52 = vld [vmem:[#allocation2 + $0xe8] sm:$0xff]  ;;  %v1504_v0 = vld [vmem:[#allocation2 + $0xe0] sm:$0xff]  ;;  %v1503_v21 = vld [vmem:[#allocation2 + $0xd8] sm:$0xff] }
 0x2fc   : > { %1535 = vperm.xlu2 %2222, %v1481_v11   ;;  %v1507_v32 = vld [vmem:[#allocation2 + $0xf8] sm:$0xff]  ;;  %v1506_v56 = vld [vmem:[#allocation2 + $0xf0] sm:$0xff] }
 0x2fd   : > { %1525 = vperm.xlu1 %2221, %v1479_v18   ;;  %1515 = vperm.xlu0 %2220, %v1477_v61   ;;  %v3348_v51 = vld [vmem:[#allocation9_spill] sm:$0xff] }
 0x304   : > { %1550 = vperm.xlu2 %2222, %v1484_v31  }
 0x305   : > { %1545 = vperm.xlu1 %2221, %v1483_v8   ;;  %1540 = vperm.xlu0 %2220, %v1482_v20   ;;  %v3349_v8 = vld [vmem:[#allocation8_spill] sm:$0xff] }
 0x30c   : > { %1565 = vperm.xlu2 %2222, %v1487_v23   ;;  %v3350_v23 = vld [vmem:[#allocation7_spill] sm:$0xff] }
 0x30d   : > { %1560 = vperm.xlu1 %2221, %v1486_v28   ;;  %1555 = vperm.xlu0 %2220, %v1485_v40  }
 0x314   : > { %1580 = vperm.xlu2 %2222, %v1490_v39  }
 0x315   : > { %1575 = vperm.xlu1 %2221, %v1489_v24   ;;  %1570 = vperm.xlu0 %2220, %v1488_v35  }
 0x31c   : > { %1595 = vperm.xlu2 %2222, %v1493_v37  }
 0x31d   : > { %1590 = vperm.xlu1 %2221, %v1492_v47   ;;  %1585 = vperm.xlu0 %2220, %v1491_v27  }
 0x324   : > { %1610 = vperm.xlu2 %2222, %v1496_v36   ;;  %v3351_v36 = vld [vmem:[#allocation10_spill] sm:$0xff] }
 0x325   : > { %1605 = vperm.xlu1 %2221, %v1495_v12   ;;  %1600 = vperm.xlu0 %2220, %v1494_v3  }
 0x32c   : > { %1625 = vperm.xlu2 %2222, %v1499_v16  }
 0x32d   : > { %1620 = vperm.xlu1 %2221, %v1498_v7   ;;  %1615 = vperm.xlu0 %2220, %v1497_v15  }
 0x334   : > { %1640 = vperm.xlu2 %2222, %v1502_v43  }
 0x335   : > { %1635 = vperm.xlu1 %2221, %v1501_v48   ;;  %1630 = vperm.xlu0 %2220, %v1500_v59  }
 0x33c   : > { %1655 = vperm.xlu2 %2222, %v1505_v52  }
 0x33d   : > { %1650 = vperm.xlu1 %2221, %v1504_v0   ;;  %1645 = vperm.xlu0 %2220, %v1503_v21  }
 0x345   : > { %1665 = vperm.xlu1 %2221, %v1507_v32   ;;  %1660 = vperm.xlu0 %2220, %v1506_v56  }
 0x34e   : > { %v1531_v55 = vpop.permute.xlu2 %1530 }
 0x34f   : > { %v1672_v4 = vsub.f32 %v2453_v53, %v1531_v55 }
 0x351   : > { %1704 = vst [vmem:[#allocation4 + $0x20] sm:$0xff] %v1672_v4 }
 0x356   : > { %v1536_v44 = vpop.permute.xlu2 %1535 }
 0x357   : > { %v1673_v60 = vsub.f32 %v3348_v51, %v1536_v44 }
 0x359   : > { %1705 = vst [vmem:[#allocation4 + $0x28] sm:$0xff] %v1673_v60 }
 0x35e   : > { %v1551_v63 = vpop.permute.xlu2 %1550 }
 0x35f   : > { %v1676_v13 = vsub.f32 %v2408_v22, %v1551_v63 }
 0x361   : > { %1708 = vst [vmem:[#allocation4 + $0x40] sm:$0xff] %v1676_v13 }
 0x366   : > { %v1566_v11 = vpop.permute.xlu2 %1565 }
 0x367   : > { %v1679_v18 = vsub.f32 %v2444_v46, %v1566_v11  ;;  %v1521_v61 = vpop.permute.xlu1 %1520  ;;  %v1511_v31 = vpop.permute.xlu0 %1510 }
 0x368   : > { %v1670_v20 = vsub.f32 %v3349_v8, %v1521_v61  ;;  %v1668_v28 = vsub.f32 %v3350_v23, %v1511_v31 }
 0x369   : > { %1711 = vst [vmem:[#allocation4 + $0x58] sm:$0xff] %v1679_v18 }
 0x36a   : > { %1702 = vst [vmem:[#allocation4 + $0x10] sm:$0xff] %v1670_v20 }
 0x36b   : > { %1700 = vst [vmem:[#allocation4] sm:$0xff] %v1668_v28 }
 0x36e   : > { %v1581_v53 = vpop.permute.xlu2 %1580 }
 0x36f   : > { %v1682_v40 = vsub.f32 %v2480_v6, %v1581_v53  ;;  %v1526_v39 = vpop.permute.xlu1 %1525  ;;  %v1516_v24 = vpop.permute.xlu0 %1515 }
 0x370   : > { %v1671_v22 = vsub.f32 %v2441_v45, %v1526_v39  ;;  %v1669_v35 = vsub.f32 %v2417_v29, %v1516_v24 }
 0x371   : > { %1714 = vst [vmem:[#allocation4 + $0x70] sm:$0xff] %v1682_v40 }
 0x372   : > { %1703 = vst [vmem:[#allocation4 + $0x18] sm:$0xff] %v1671_v22 }
 0x373   : > { %1701 = vst [vmem:[#allocation4 + $0x8] sm:$0xff] %v1669_v35 }
 0x376   : > { %v1596_v46 = vpop.permute.xlu2 %1595 }
 0x377   : > { %v1685_v37 = vsub.f32 %v2423_v33, %v1596_v46  ;;  %v1546_v47 = vpop.permute.xlu1 %1545  ;;  %v1541_v27 = vpop.permute.xlu0 %1540 }
 0x378   : > { %v1675_v12 = vsub.f32 %v3351_v36, %v1546_v47  ;;  %v1674_v3 = vsub.f32 %v2477_v5, %v1541_v27 }
 0x379   : > { %1717 = vst [vmem:[#allocation4 + $0x88] sm:$0xff] %v1685_v37 }
 0x37a   : > { %1707 = vst [vmem:[#allocation4 + $0x38] sm:$0xff] %v1675_v12 }
 0x37b   : > { %1706 = vst [vmem:[#allocation4 + $0x30] sm:$0xff] %v1674_v3 }
 0x37e   : > { %v1611_v6 = vpop.permute.xlu2 %1610 }
 0x37f   : > { %v1688_v45 = vsub.f32 %v2459_v57, %v1611_v6  ;;  %v1561_v16 = vpop.permute.xlu1 %1560  ;;  %v1556_v29 = vpop.permute.xlu0 %1555 }
 0x380   : > { %v1678_v7 = vsub.f32 %v2432_v38, %v1561_v16  ;;  %v1677_v15 = vsub.f32 %v2420_v30, %v1556_v29 }
 0x381   : > { %1720 = vst [vmem:[#allocation4 + $0xa0] sm:$0xff] %v1688_v45 }
 0x382   : > { %1710 = vst [vmem:[#allocation4 + $0x50] sm:$0xff] %v1678_v7 }
 0x383   : > { %1709 = vst [vmem:[#allocation4 + $0x48] sm:$0xff] %v1677_v15 }
 0x386   : > { %v1626_v33 = vpop.permute.xlu2 %1625 }
 0x387   : > { %v1691_v43 = vsub.f32 %v2495_v17, %v1626_v33  ;;  %v1576_v48 = vpop.permute.xlu1 %1575  ;;  %v1571_v5 = vpop.permute.xlu0 %1570 }
 0x388   : > { %v1681_v59 = vsub.f32 %v2468_v62, %v1576_v48  ;;  %v1680_v52 = vsub.f32 %v2456_v54, %v1571_v5 }
 0x389   : > { %1723 = vst [vmem:[#allocation4 + $0xb8] sm:$0xff] %v1691_v43 }
 0x38a   : > { %1713 = vst [vmem:[#allocation4 + $0x68] sm:$0xff] %v1681_v59 }
 0x38b   : > { %1712 = vst [vmem:[#allocation4 + $0x60] sm:$0xff] %v1680_v52 }
 0x38e   : > { %v1641_v57 = vpop.permute.xlu2 %1640 }
 0x38f   : > { %v1694_v38 = vsub.f32 %v2438_v42, %v1641_v57  ;;  %v1591_v0 = vpop.permute.xlu1 %1590  ;;  %v1586_v30 = vpop.permute.xlu0 %1585 }
 0x390   : > { %v1684_v21 = vsub.f32 %v2411_v25, %v1591_v0  ;;  %v1683_v32 = vsub.f32 %v2492_v14, %v1586_v30 }
 0x391   : > { %1726 = vst [vmem:[#allocation4 + $0xd0] sm:$0xff] %v1694_v38 }
 0x392   : > { %1716 = vst [vmem:[#allocation4 + $0x80] sm:$0xff] %v1684_v21 }
 0x393   : > { %1715 = vst [vmem:[#allocation4 + $0x78] sm:$0xff] %v1683_v32 }
 0x396   : > { %v1656_v17 = vpop.permute.xlu2 %1655 }
 0x397   : > { %v1697_v62 = vsub.f32 %v2474_v2, %v1656_v17  ;;  %v1606_v56 = vpop.permute.xlu1 %1605  ;;  %v1601_v54 = vpop.permute.xlu0 %1600 }
 0x398   : > { %v1687_v55 = vsub.f32 %v2447_v49, %v1606_v56  ;;  %v1686_v4 = vsub.f32 %v2435_v41, %v1601_v54 }
 0x399   : > { %1729 = vst [vmem:[#allocation4 + $0xe8] sm:$0xff] %v1697_v62 }
 0x39a   : > { %1719 = vst [vmem:[#allocation4 + $0x98] sm:$0xff] %v1687_v55 }
 0x39b   : > { %1718 = vst [vmem:[#allocation4 + $0x90] sm:$0xff] %v1686_v4 }
 0x39f   : > { %v1621_v42 = vpop.permute.xlu1 %1620  ;;  %v1616_v44 = vpop.permute.xlu0 %1615 }
 0x3a0   : > { %v1690_v25 = vsub.f32 %v2483_v9, %v1621_v42  ;;  %v1689_v14 = vsub.f32 %v2471_v1, %v1616_v44 }
 0x3a2   : > { %1722 = vst [vmem:[#allocation4 + $0xb0] sm:$0xff] %v1690_v25 }
 0x3a3   : > { %1721 = vst [vmem:[#allocation4 + $0xa8] sm:$0xff] %v1689_v14 }
 0x3a7   : > { %v1636_v51 = vpop.permute.xlu1 %1635  ;;  %v1631_v60 = vpop.permute.xlu0 %1630 }
 0x3a8   : > { %v1693_v2 = vsub.f32 %v2426_v34, %v1636_v51  ;;  %v1692_v63 = vsub.f32 %v2414_v26, %v1631_v60 }
 0x3aa   : > { %1725 = vst [vmem:[#allocation4 + $0xc8] sm:$0xff] %v1693_v2 }
 0x3ab   : > { %1724 = vst [vmem:[#allocation4 + $0xc0] sm:$0xff] %v1692_v63 }
 0x3af   : > { %v1651_v41 = vpop.permute.xlu1 %1650  ;;  %v1646_v49 = vpop.permute.xlu0 %1645 }
 0x3b0   : > { %v1696_v13 = vsub.f32 %v2462_v58, %v1651_v41  ;;  %v1695_v11 = vsub.f32 %v2450_v50, %v1646_v49 }
 0x3b2   : > { %1728 = vst [vmem:[#allocation4 + $0xe0] sm:$0xff] %v1696_v13 }
 0x3b3   : > { %1727 = vst [vmem:[#allocation4 + $0xd8] sm:$0xff] %v1695_v11 }
 0x3b7   : > { %v1666_v9 = vpop.permute.xlu1 %1665  ;;  %v1661_v1 = vpop.permute.xlu0 %1660 }
 0x3b8   : > { %v1699_v18 = vsub.f32 %v2498_v19, %v1666_v9  ;;  %v1698_v61 = vsub.f32 %v2486_v10, %v1661_v1 }
 0x3ba   : > { %1731 = vst [vmem:[#allocation4 + $0xf8] sm:$0xff] %v1699_v18 }
 0x3bb   : > { %1730 = vst [vmem:[#allocation4 + $0xf0] sm:$0xff] %v1698_v61 }
 0x3bc PF: > { %p1990_p7 = scmp.eq.s32.totalorder %s1855_s15, 1  ;;  %s1749_s9 = sshll.u32 %s3166_s3, 4  ;;  %s1750_s9 = int_to_ptr.hbm [resolvable:$true] %s1749_s9 }
 0x3bd   : > { %s2283_s10 = smov [#allocation4]   ;;  %s2284_s18 = smov 128  }
 0x3be   : > { %s1747_s11 = sshll.u32 %s2283_s10, 4  ;;  %s2285_s19 = smov 8   ;;  %s1748_s11 = int_to_ptr.vmem [resolvable:$true] %s1747_s11 }
 0x3bf   : > { %1983 = dma.vmem_to_hbm [thread:$0]  (%p1990_p7), %s1748_s11, 4096, %s1750_s9, [#allocation5], %s2284_s18, %s2284_s18, %s2285_s19  }
 0x3c0 PF: > { %p1991_p8 = scmp.ge.s32.totalorder %s2277_s14, 2  ;;  %p1992_p9 = scmp.eq.s32.totalorder %s1856_s16, 1 }
 0x3c2   : > { %p1987_p10 = pnand %p1992_p9, %p1991_p8 }
 0x3c4   : > { %p1988_p11 = pneg %p1987_p10 }
 0x3c6   : > { %2264 = dma.done.wait (%p1988_p11), [#allocation5], 4096  }
 0x3c7   : > { %2266 = vsyncadd (%p1988_p11), [#allocation5], 4294963200  ;;  %s16_s14 = sadd.s32 1, %s2277_s14   ;;  %s3352_s12 = smov %s2273_s13 }
 0x3c8   : > { %p13_p12 = scmp.ge.s32.totalorder %s16_s14, 4   ;;  %s3353_s13 = smov %s3355_s17 }
 0x3ca   :  { %15 = sbr.rel (!%p13_p12) target bundleno = 3 (0x3), region = 89 }
 0x3cf   :  { %1771 = vsyncpa [#allocation5], 1 }
 0x3d0   :  { %1773 = vsyncpa [#allocation5 + $0x1], 1 }

</bundles_post_ra>
